<compile_context>
chip_gen: v7x
topology: tpu7x:2x2x1
jax: 0.10.0
libtpu: 0.0.40
codegen_flags: <defaults>
</compile_context>

<pallas_src>
import jax
import jax.numpy as jnp
from jax.experimental import pallas as pl
from jax.experimental.pallas import tpu as pltpu


def tfmlp_kernel(x_ref, w1_ref, b1_ref, w2_ref, b2_ref, w3_ref, b3_ref, o_ref):
    # fc1 + ReLU  (bf16 MXU inputs, f32 accumulation & elementwise)
    h1 = jnp.dot(x_ref[...], w1_ref[...],
                 preferred_element_type=jnp.float32) + b1_ref[...]
    h1 = jnp.maximum(h1, 0.0)

    # Dropout(p=0.5): inference-mode identity.
    # TODO(synk): training-mode dropout would need pltpu.prng_seed /
    # prng_random_bits + mask * 1/(1-p); eval semantics are deterministic.

    # fc2 + Sigmoid
    h2 = jnp.dot(h1.astype(jnp.bfloat16), w2_ref[...],
                 preferred_element_type=jnp.float32) + b2_ref[...]
    h2 = jax.nn.sigmoid(h2)

    # fc3
    o_ref[...] = (jnp.dot(h2.astype(jnp.bfloat16), w3_ref[...],
                          preferred_element_type=jnp.float32)
                  + b3_ref[...]).astype(o_ref.dtype)


def tfmlp_forward(x_in, params, *, tb_max=256):
    """x_in: any shape (B, ...); flattened to (B, F) like torch.flatten(start_dim=1)."""
    B = x_in.shape[0]
    x = x_in.reshape(B, -1)
    F_in = x.shape[1]

    w1, b1, w2, b2, w3, b3 = params
    h1_dim = w1.shape[1]
    h2_dim = w2.shape[1]
    out_dim = w3.shape[1]

    # Batch tile: multiple of 8 sublanes, capped at tb_max; pad B to a multiple of TB.
    TB = min(tb_max, max(8, ((B + 7) // 8) * 8))
    B_pad = ((B + TB - 1) // TB) * TB
    if B_pad != B:
        x = jnp.pad(x, ((0, B_pad - B), (0, 0)))
    x = x.astype(jnp.bfloat16)

    grid = (B_pad // TB,)

    flops = 2 * B_pad * (F_in * h1_dim + h1_dim * h2_dim + h2_dim * out_dim)
    bytes_accessed = (x.size * x.dtype.itemsize
                      + sum(int(p.size) * p.dtype.itemsize for p in params)
                      + B_pad * out_dim * 4)

    def const_spec(shape):
        # Resident operand: same block every grid step -> DMA'd once.
        return pl.BlockSpec(shape, lambda i: (0, 0))

    y = pl.pallas_call(
        tfmlp_kernel,
        out_shape=jax.ShapeDtypeStruct((B_pad, out_dim), jnp.float32),
        grid=grid,
        in_specs=[
            pl.BlockSpec((TB, F_in), lambda i: (i, 0)),   # x tile streams over batch
            const_spec(w1.shape), const_spec(b1.shape),
            const_spec(w2.shape), const_spec(b2.shape),
            const_spec(w3.shape), const_spec(b3.shape),
        ],
        out_specs=pl.BlockSpec((TB, out_dim), lambda i: (i, 0)),
        compiler_params=pltpu.CompilerParams(
            dimension_semantics=("parallel",),
            vmem_limit_bytes=32 * 1024 * 1024,
        ),
        cost_estimate=pl.CostEstimate(
            flops=flops,
            transcendentals=B_pad * h2_dim,   # sigmoid
            bytes_accessed=bytes_accessed,
        ),
    )(x, w1, b1, w2, b2, w3, b3)

    y = y[:B]
    # torch .squeeze(): drop all size-1 dims
    return jnp.squeeze(y)


def init_params(key, input_features=32, fc1_nodes=1024):
    """Deterministic synthetic parameters (PyTorch Linear shapes, stored transposed).

    Weights are kept in bf16 (MXU-native, halves weight DMA); biases stay f32.
    """
    dims = [(input_features, fc1_nodes),
            (fc1_nodes, fc1_nodes // 2),
            (fc1_nodes // 2, fc1_nodes // 4)]
    params = []
    for (fan_in, fan_out) in dims:
        key, kw, kb = jax.random.split(key, 3)
        bound = 1.0 / jnp.sqrt(fan_in)
        w = jax.random.uniform(kw, (fan_in, fan_out), jnp.float32, -bound, bound)
        b = jax.random.uniform(kb, (1, fan_out), jnp.float32, -bound, bound)
        params += [w.astype(jnp.bfloat16), b]
    return params


if __name__ == "__main__":
    key = jax.random.PRNGKey(0)
    k_x, k_p = jax.random.split(key)

    B, F = 2, 32  # module default input_features=32
    x = jax.random.normal(k_x, (B, F), jnp.float32)

    params = init_params(k_p, input_features=F, fc1_nodes=1024)

    y = tfmlp_forward(x, params)
    jax.block_until_ready(y)

    assert y.shape == (B, 256), y.shape
    print("KERNEL_OK")
</pallas_src>

<mosaic_0001>
module attributes {stable_mosaic.version = 11 : i64} {
  func.func @tfmlp_kernel(%arg0: i32, %arg1: memref<8x32xbf16, #tpu.memory_space<vmem>>, %arg2: memref<32x1024xbf16, #tpu.memory_space<vmem>>, %arg3: memref<1x1024xf32, #tpu.memory_space<vmem>>, %arg4: memref<1024x512xbf16, #tpu.memory_space<vmem>>, %arg5: memref<1x512xf32, #tpu.memory_space<vmem>>, %arg6: memref<512x256xbf16, #tpu.memory_space<vmem>>, %arg7: memref<1x256xf32, #tpu.memory_space<vmem>>, %arg8: memref<8x256xf32, #tpu.memory_space<vmem>>) attributes {dimension_semantics = [#tpu.dimension_semantics<parallel>], iteration_bounds = array<i64: 1>, scalar_prefetch = 0 : i64, scratch_operands = 0 : i64, tpu.core_type = #tpu.core_type<tc>, window_params = [{transform_indices = @transform_0, window_bounds = array<i64: 8, 32>}, {pipeline_mode = #tpu.pipeline_mode<synchronous>, transform_indices = @transform_1, window_bounds = array<i64: 32, 1024>}, {pipeline_mode = #tpu.pipeline_mode<synchronous>, transform_indices = @transform_2, window_bounds = array<i64: 1, 1024>}, {pipeline_mode = #tpu.pipeline_mode<synchronous>, transform_indices = @transform_3, window_bounds = array<i64: 1024, 512>}, {pipeline_mode = #tpu.pipeline_mode<synchronous>, transform_indices = @transform_4, window_bounds = array<i64: 1, 512>}, {pipeline_mode = #tpu.pipeline_mode<synchronous>, transform_indices = @transform_5, window_bounds = array<i64: 512, 256>}, {pipeline_mode = #tpu.pipeline_mode<synchronous>, transform_indices = @transform_6, window_bounds = array<i64: 1, 256>}, {transform_indices = @transform_7, window_bounds = array<i64: 8, 256>}]} {
    %c0 = arith.constant 0 : index
    %c0_0 = arith.constant 0 : index
    %0 = vector.load %arg1[%c0, %c0_0] : memref<8x32xbf16, #tpu.memory_space<vmem>>, vector<8x32xbf16>
    %c0_1 = arith.constant 0 : index
    %c0_2 = arith.constant 0 : index
    %1 = vector.load %arg2[%c0_1, %c0_2] : memref<32x1024xbf16, #tpu.memory_space<vmem>>, vector<32x1024xbf16>
    %cst = arith.constant dense<0.000000e+00> : vector<8x1024xf32>
    %2 = tpu.matmul %0, %1, %cst {dimension_numbers = #tpu.dot_dimension_numbers<[1], [0], [0], [1], [0, 0, 1, 1], [], []>} : vector<8x32xbf16>, vector<32x1024xbf16>, vector<8x1024xf32> -> vector<8x1024xf32>
    %c0_3 = arith.constant 0 : index
    %c0_4 = arith.constant 0 : index
    %3 = vector.load %arg3[%c0_3, %c0_4] : memref<1x1024xf32, #tpu.memory_space<vmem>>, vector<1x1024xf32>
    %4 = vector.broadcast %3 : vector<1x1024xf32> to vector<8x1024xf32>
    %5 = arith.addf %2, %4 : vector<8x1024xf32>
    %cst_5 = arith.constant 0.000000e+00 : f32
    %6 = vector.broadcast %cst_5 : f32 to vector<8x1024xf32>
    %7 = arith.maximumf %5, %6 : vector<8x1024xf32>
    %8 = arith.truncf %7 : vector<8x1024xf32> to vector<8x1024xbf16>
    %c0_6 = arith.constant 0 : index
    %c0_7 = arith.constant 0 : index
    %9 = vector.load %arg4[%c0_6, %c0_7] : memref<1024x512xbf16, #tpu.memory_space<vmem>>, vector<1024x512xbf16>
    %cst_8 = arith.constant dense<0.000000e+00> : vector<8x512xf32>
    %10 = tpu.matmul %8, %9, %cst_8 {dimension_numbers = #tpu.dot_dimension_numbers<[1], [0], [0], [1], [0, 0, 1, 1], [], []>} : vector<8x1024xbf16>, vector<1024x512xbf16>, vector<8x512xf32> -> vector<8x512xf32>
    %c0_9 = arith.constant 0 : index
    %c0_10 = arith.constant 0 : index
    %11 = vector.load %arg5[%c0_9, %c0_10] : memref<1x512xf32, #tpu.memory_space<vmem>>, vector<1x512xf32>
    %12 = vector.broadcast %11 : vector<1x512xf32> to vector<8x512xf32>
    %13 = arith.addf %10, %12 : vector<8x512xf32>
    %14 = arith.negf %13 : vector<8x512xf32>
    %15 = math.exp %14 : vector<8x512xf32>
    %cst_11 = arith.constant 1.000000e+00 : f32
    %16 = vector.broadcast %cst_11 : f32 to vector<8x512xf32>
    %17 = arith.addf %16, %15 : vector<8x512xf32>
    %18 = arith.divf %16, %17 : vector<8x512xf32>
    %19 = arith.truncf %18 : vector<8x512xf32> to vector<8x512xbf16>
    %c0_12 = arith.constant 0 : index
    %c0_13 = arith.constant 0 : index
    %20 = vector.load %arg6[%c0_12, %c0_13] : memref<512x256xbf16, #tpu.memory_space<vmem>>, vector<512x256xbf16>
    %cst_14 = arith.constant dense<0.000000e+00> : vector<8x256xf32>
    %21 = tpu.matmul %19, %20, %cst_14 {dimension_numbers = #tpu.dot_dimension_numbers<[1], [0], [0], [1], [0, 0, 1, 1], [], []>} : vector<8x512xbf16>, vector<512x256xbf16>, vector<8x256xf32> -> vector<8x256xf32>
    %c0_15 = arith.constant 0 : index
    %c0_16 = arith.constant 0 : index
    %22 = vector.load %arg7[%c0_15, %c0_16] : memref<1x256xf32, #tpu.memory_space<vmem>>, vector<1x256xf32>
    %23 = vector.broadcast %22 : vector<1x256xf32> to vector<8x256xf32>
    %24 = arith.addf %21, %23 : vector<8x256xf32>
    %c0_17 = arith.constant 0 : index
    %c0_18 = arith.constant 0 : index
    %25 = vector.load %arg8[%c0_17, %c0_18] : memref<8x256xf32, #tpu.memory_space<vmem>>, vector<8x256xf32>
    tpu.vector_store %arg8[%c0_17, %c0_18], %24 {strides = array<i32>} : memref<8x256xf32, #tpu.memory_space<vmem>>, vector<8x256xf32>,
    return
  }
  func.func @transform_0(%arg0: i32) -> (i32, i32) {
    %c0_i32 = arith.constant 0 : i32
    %c0_i32_0 = arith.constant 0 : i32
    return %arg0, %c0_i32 : i32, i32
  }
  func.func @transform_1(%arg0: i32) -> (i32, i32) {
    %c0_i32 = arith.constant 0 : i32
    %c0_i32_0 = arith.constant 0 : i32
    %c0_i32_1 = arith.constant 0 : i32
    return %c0_i32, %c0_i32_0 : i32, i32
  }
  func.func @transform_2(%arg0: i32) -> (i32, i32) {
    %c0_i32 = arith.constant 0 : i32
    %c0_i32_0 = arith.constant 0 : i32
    %c0_i32_1 = arith.constant 0 : i32
    return %c0_i32, %c0_i32_0 : i32, i32
  }
  func.func @transform_3(%arg0: i32) -> (i32, i32) {
    %c0_i32 = arith.constant 0 : i32
    %c0_i32_0 = arith.constant 0 : i32
    %c0_i32_1 = arith.constant 0 : i32
    return %c0_i32, %c0_i32_0 : i32, i32
  }
  func.func @transform_4(%arg0: i32) -> (i32, i32) {
    %c0_i32 = arith.constant 0 : i32
    %c0_i32_0 = arith.constant 0 : i32
    %c0_i32_1 = arith.constant 0 : i32
    return %c0_i32, %c0_i32_0 : i32, i32
  }
  func.func @transform_5(%arg0: i32) -> (i32, i32) {
    %c0_i32 = arith.constant 0 : i32
    %c0_i32_0 = arith.constant 0 : i32
    %c0_i32_1 = arith.constant 0 : i32
    return %c0_i32, %c0_i32_0 : i32, i32
  }
  func.func @transform_6(%arg0: i32) -> (i32, i32) {
    %c0_i32 = arith.constant 0 : i32
    %c0_i32_0 = arith.constant 0 : i32
    %c0_i32_1 = arith.constant 0 : i32
    return %c0_i32, %c0_i32_0 : i32, i32
  }
  func.func @transform_7(%arg0: i32) -> (i32, i32) {
    %c0_i32 = arith.constant 0 : i32
    %c0_i32_0 = arith.constant 0 : i32
    return %arg0, %c0_i32 : i32, i32
  }
}

</mosaic_0001>

<bundles_post_ra>
// kernel: tpu_custom_call.1
= control target key start
LH: loop header
LB: loop body
LE: loop exit
PB: predicated region body
PF: predicated region fallthrough
CT: control target
= control target key end

     0   :  { %12 = vsyncpa [#allocation3], 0  ;;  %s4073_s0 = inlined_call_operand.hbm [shape: bf16[8,32], index: 0, kind: input, shape index: {}]   ;;  %s4074_s1 = inlined_call_operand.hbm [shape: bf16[32,1024], index: 1, kind: input, shape index: {}]   ;;  %s4075_s2 = inlined_call_operand.hbm [shape: f32[1,1024], index: 2, kind: input, shape index: {}]   ;;  %s4076_s3 = inlined_call_operand.hbm [shape: bf16[1024,512], index: 3, kind: input, shape index: {}]   ;;  %s4077_s4 = inlined_call_operand.vmem [shape: f32[1,512], index: 4, kind: input, shape index: {}]   ;;  %s4078_s5 = inlined_call_operand.hbm [shape: bf16[512,256], index: 5, kind: input, shape index: {}]   ;;  %s4079_s6 = inlined_call_operand.vmem [shape: f32[1,256], index: 6, kind: input, shape index: {}]   ;;  %s4080_s7 = inlined_call_operand.hbm [shape: f32[8,256], index: 7, kind: output, shape index: {}]  }
   0x1   :  { %13 = vsyncpa [#allocation6], 0 }
   0x2   :  { %14 = vsyncpa [#allocation9], 0 }
   0x3   :  { %15 = vsyncpa [#allocation4], 0  ;;  %s3851_s24 = smov [#allocation5]   ;;  %s3711_s28 = scalar_lea.hbm %s4074_s1, 2048 }
   0x4   :  { %s31_s25 = sshll.u32 %s3851_s24, 4  ;;  %p3712_p0 = scmp.ne.s32.totalorder %s4074_s1, %s3711_s28  ;;  %s32_s25 = int_to_ptr.vmem [resolvable:$true] %s31_s25 }
   0x5   :  { %p3715_p1 = scmp.lt.u32.totalorder %s3711_s28, %s4074_s1 }
   0x7   :  { %p3717_p2 = pnand %p3715_p1, %p3712_p0 }
   0x9   :  { %3720 = shalt.err (!%p3717_p2)
}
   0xa   :  { %s3721_s10 = scalar_lea.vmem %s32_s25, 2048  ;;  %p3726_p4 = scmp.lt.s32.totalorder %s32_s25, %s32_s25 }
   0xb   :  { %p3722_p3 = scmp.ne.s32.totalorder %s32_s25, %s3721_s10  ;;  %p3727_p5 = scmp.lt.s32.totalorder %s3721_s10, %s3721_s10 }
   0xd   :  { %p3728_p6 = por %p3727_p5, %p3726_p4 }
   0xf   :  { %p3729_p7 = pnand %p3728_p6, %p3722_p3 }
  0x11   :  { %3732 = shalt.err (!%p3729_p7)
}
  0x12   :  { %s3852_s11 = smov 512   ;;  %s3853_s12 = smov 32  }
  0x13   :  { %37 = dma.hbm_to_vmem [thread:$0]  %s4074_s1, 2048, %s32_s25, [#allocation6], %s3852_s11, %s3852_s11, %s3853_s12  }
  0x14   :  { %s3854_s15 = smov [#allocation8]   ;;  %s3733_s19 = scalar_lea.hbm %s4076_s3, 32768 }
  0x15   :  { %s53_s16 = sshll.u32 %s3854_s15, 4  ;;  %p3734_p8 = scmp.ne.s32.totalorder %s4076_s3, %s3733_s19  ;;  %s54_s16 = int_to_ptr.vmem [resolvable:$true] %s53_s16 }
  0x16   :  { %p3737_p9 = scmp.lt.u32.totalorder %s3733_s19, %s4076_s3 }
  0x18   :  { %p3739_p10 = pnand %p3737_p9, %p3734_p8 }
  0x1a   :  { %3742 = shalt.err (!%p3739_p10)
}
  0x1b   :  { %s3743_s24 = scalar_lea.vmem %s54_s16, 32768  ;;  %p3748_p12 = scmp.lt.s32.totalorder %s54_s16, %s54_s16 }
  0x1c   :  { %p3744_p11 = scmp.ne.s32.totalorder %s54_s16, %s3743_s24  ;;  %p3749_p13 = scmp.lt.s32.totalorder %s3743_s24, %s3743_s24 }
  0x1e   :  { %p3750_p0 = por %p3749_p13, %p3748_p12 }
  0x20   :  { %p3751_p1 = pnand %p3750_p0, %p3744_p11 }
  0x22   :  { %3754 = shalt.err (!%p3751_p1)
}
  0x23   :  { %s3855_s1 = smov 256   ;;  %s3856_s25 = smov 16  }
  0x24   :  { %59 = dma.hbm_to_vmem [thread:$0]  %s4076_s3, 32768, %s54_s16, [#allocation9], %s3855_s1, %s3855_s1, %s3856_s25  }
  0x25   :  { %s3857_s28 = smov [#allocation2]   ;;  %s3858_s30 = smov [#allocation7]  }
  0x26   :  { %s22_s29 = sshll.u32 %s3857_s28, 4  ;;  %s44_s8 = sshll.u32 %s3858_s30, 4  ;;  %s23_s29 = int_to_ptr.vmem [resolvable:$true] %s22_s29  ;;  %s45_s8 = int_to_ptr.vmem [resolvable:$true] %s44_s8 }
  0x27   :  { %s3755_s11 = scalar_lea.hbm %s4073_s0, 64 }
  0x28   :  { %p3756_p2 = scmp.ne.s32.totalorder %s4073_s0, %s3755_s11  ;;  %p3759_p3 = scmp.lt.u32.totalorder %s3755_s11, %s4073_s0 }
  0x2a   :  { %p3761_p4 = pnand %p3759_p3, %p3756_p2 }
  0x2c   :  { %3764 = shalt.err (!%p3761_p4)
}
  0x2d   :  { %s3765_s3 = scalar_lea.vmem %s23_s29, 64  ;;  %p3770_p6 = scmp.lt.s32.totalorder %s23_s29, %s23_s29 }
  0x2e   :  { %p3766_p5 = scmp.ne.s32.totalorder %s23_s29, %s3765_s3  ;;  %p3771_p7 = scmp.lt.s32.totalorder %s3765_s3, %s3765_s3 }
  0x30   :  { %p3772_p8 = por %p3771_p7, %p3770_p6 }
  0x32   :  { %p3773_p9 = pnand %p3772_p8, %p3766_p5 }
  0x34   :  { %3776 = shalt.err (!%p3773_p9)
}
  0x35   :  { %25 = dma.hbm_to_vmem [thread:$0]  %s4073_s0, 64, %s23_s29, [#allocation3]  }
  0x36   :  { %s3777_s20 = scalar_lea.hbm %s4075_s2, 128 }
  0x37   :  { %p3778_p10 = scmp.ne.s32.totalorder %s4075_s2, %s3777_s20  ;;  %p3781_p11 = scmp.lt.u32.totalorder %s3777_s20, %s4075_s2 }
  0x39   :  { %p3783_p12 = pnand %p3781_p11, %p3778_p10 }
  0x3b   :  { %3786 = shalt.err (!%p3783_p12)
}
  0x3c   :  { %s3787_s1 = scalar_lea.vmem %s45_s8, 128  ;;  %p3792_p0 = scmp.lt.s32.totalorder %s45_s8, %s45_s8 }
  0x3d   :  { %p3788_p13 = scmp.ne.s32.totalorder %s45_s8, %s3787_s1  ;;  %p3793_p1 = scmp.lt.s32.totalorder %s3787_s1, %s3787_s1 }
  0x3f   :  { %p3794_p2 = por %p3793_p1, %p3792_p0 }
  0x41   :  { %p3795_p3 = pnand %p3794_p2, %p3788_p13 }
  0x43   :  { %3798 = shalt.err (!%p3795_p3)
}
  0x44   :  { %47 = dma.hbm_to_vmem [thread:$0]  %s4075_s2, 128, %s45_s8, [#allocation6]  }
  0x45   :  { %s3859_s26 = smov [#allocation10]   ;;  %s3799_s30 = scalar_lea.hbm %s4078_s5, 8192 }
  0x46   :  { %s67_s27 = sshll.u32 %s3859_s26, 4  ;;  %p3800_p4 = scmp.ne.s32.totalorder %s4078_s5, %s3799_s30  ;;  %s68_s27 = int_to_ptr.vmem [resolvable:$true] %s67_s27 }
  0x47   :  { %p3803_p5 = scmp.lt.u32.totalorder %s3799_s30, %s4078_s5 }
  0x49   :  { %p3805_p6 = pnand %p3803_p5, %p3800_p4 }
  0x4b   :  { %3808 = shalt.err (!%p3805_p6)
}
  0x4c   :  { %s3809_s13 = scalar_lea.vmem %s68_s27, 8192  ;;  %p3814_p8 = scmp.lt.s32.totalorder %s68_s27, %s68_s27 }
  0x4d   :  { %p3810_p7 = scmp.ne.s32.totalorder %s68_s27, %s3809_s13  ;;  %p3815_p9 = scmp.lt.s32.totalorder %s3809_s13, %s3809_s13 }
  0x4f   :  { %p3816_p10 = por %p3815_p9, %p3814_p8 }
  0x51   :  { %p3817_p11 = pnand %p3816_p10, %p3810_p7 }
  0x53   :  { %3820 = shalt.err (!%p3817_p11)
}
  0x54   :  { %s3860_s2 = smov 128   ;;  %s3861_s8 = smov 8  }
  0x55   :  { %73 = dma.hbm_to_vmem [thread:$0]  %s4078_s5, 8192, %s68_s27, [#allocation9], %s3860_s2, %s3860_s2, %s3861_s8  }
  0x56   :  { %3843 = dma.done.wait [#allocation3], 64  }
  0x57   :  { %3844 = vsyncadd [#allocation3], 4294967232 }
  0x58   :  { %3845 = dma.done.wait [#allocation6], 2176  }
  0x59   :  { %3846 = vsyncadd [#allocation6], 4294965120 }
  0x5a   :  { %3847 = dma.done.wait [#allocation9], 40960  }
  0x5b   :  { %3848 = vsyncadd [#allocation9], 4294926336  ;;  %v3862_v0 = vmov 0   ;;  %v93_v1 = vld [vmem:[#allocation5] sm:$0xff]  ;;  %v94_v3 = vld [vmem:[#allocation5 + $0x8] sm:$0xff]  ;;  %vm231_vm0 = vcmask 261120  }
  0x5c   :  { %267 = vmatprep.mubr.bf16.mxu0 %v3862_v0  ;;  %308 = vmatprep.mubr.bf16.mxu1 %v3862_v0  ;;  %v97_v2 = vld [vmem:[#allocation5 + $0x20] sm:$0xff]  ;;  %v98_v5 = vld [vmem:[#allocation5 + $0x28] sm:$0xff]  ;;  %v95_v15 = vld [vmem:[#allocation5 + $0x10] sm:$0xff]  ;;  %s3863_s17 = smov [#allocation11]  }
  0x5d   :  { %v2827_v4 = vcombine.high %v93_v1, %v97_v2  ;;  %v2826_v6 = vcombine.low %v93_v1, %v97_v2  ;;  %v101_v7 = vld [vmem:[#allocation5 + $0x40] sm:$0xff]  ;;  %v2829_v9 = vcombine.high %v94_v3, %v98_v5  ;;  %v2828_v10 = vcombine.low %v94_v3, %v98_v5  ;;  %v102_v12 = vld [vmem:[#allocation5 + $0x48] sm:$0xff]  ;;  %v99_v16 = vld [vmem:[#allocation5 + $0x30] sm:$0xff]  ;;  %s2815_s18 = sshll.u32 %s3863_s17, 4  ;;  %s2816_s18 = int_to_ptr.vmem [resolvable:$true] %s2815_s18 }
  0x5e   :  { %v105_v8 = vld [vmem:[#allocation5 + $0x60] sm:$0xff]  ;;  %v106_v13 = vld [vmem:[#allocation5 + $0x68] sm:$0xff]  ;;  %v96_v18 = vld [vmem:[#allocation5 + $0x18] sm:$0xff]  ;;  %v2831_v21 = vcombine.high %v95_v15, %v99_v16  ;;  %v2830_v27 = vcombine.low %v95_v15, %v99_v16  ;;  %s3821_s19 = scalar_lea.vmem %s2816_s18, 256  ;;  %p3826_p13 = scmp.lt.s32.totalorder %s2816_s18, %s2816_s18 }
  0x5f   :  { %v2835_v11 = vcombine.high %v101_v7, %v105_v8  ;;  %235 = vmatprep.subr.bf16.mxu0 %v2827_v4  ;;  %v2837_v14 = vcombine.high %v102_v12, %v106_v13  ;;  %276 = vmatprep.subr.bf16.mxu1 %v2829_v9  ;;  %v2834_v17 = vcombine.low %v101_v7, %v105_v8  ;;  %v100_v19 = vld [vmem:[#allocation5 + $0x38] sm:$0xff]  ;;  %v103_v23 = vld [vmem:[#allocation5 + $0x50] sm:$0xff]  ;;  %p3822_p12 = scmp.ne.s32.totalorder %s2816_s18, %s3821_s19  ;;  %p3827_p0 = scmp.lt.s32.totalorder %s3821_s19, %s3821_s19 }
  0x60   :  { %236 = vmatpush1.bf16.msra.mxu0 %v2826_v6  ;;  %277 = vmatpush1.bf16.msra.mxu1 %v2828_v10  ;;  %v2836_v20 = vcombine.low %v102_v12, %v106_v13  ;;  %v92_v22 = vld [vmem:[#allocation2] sm:$0xf]  ;;  %v107_v24 = vld [vmem:[#allocation5 + $0x70] sm:$0xff]  ;;  %v2833_v25 = vcombine.high %v96_v18, %v100_v19  ;;  %v2832_v30 = vcombine.low %v96_v18, %v100_v19  ;;  %v3218_v36 = vld [vmem:[#allocation8 + $0x200] ss:$16 sps:$4 sm:$0xff]  }
  0x61   :  { %237 = vmatprep.subr.bf16.mxu0 %v2835_v11  ;;  %278 = vmatprep.subr.bf16.mxu1 %v2837_v14  ;;  %v104_v26 = vld [vmem:[#allocation5 + $0x58] sm:$0xff]  ;;  %v2839_v29 = vcombine.high %v103_v23, %v107_v24  ;;  %v2838_v32 = vcombine.low %v103_v23, %v107_v24  ;;  %p3828_p1 = por %p3827_p0, %p3826_p13 }
  0x62   :  { %v108_v28 = vld [vmem:[#allocation5 + $0x78] sm:$0xff] }
  0x63   :  { %v2841_v31 = vcombine.high %v104_v26, %v108_v28  ;;  %v3220_v33 = vld [vmem:[#allocation8 + $0x204] ss:$16 sps:$4 sm:$0xff]   ;;  %v2840_v34 = vcombine.low %v104_v26, %v108_v28  ;;  %v3215_v38 = vld [vmem:[#allocation8] ss:$16 sps:$4 sm:$0xff]   ;;  %p3829_p2 = pnand %p3828_p1, %p3822_p12 }
  0x64   :  { %238 = vmatpush1.bf16.msra.mxu0 %v2834_v17  ;;  %279 = vmatpush1.bf16.msra.mxu1 %v2836_v20  ;;  %v3217_v35 = vld [vmem:[#allocation8 + $0x4] ss:$16 sps:$4 sm:$0xff]   ;;  %v3224_v40 = vld [vmem:[#allocation8 + $0x220] ss:$16 sps:$4 sm:$0xff]  }
  0x65   :  { %317 = vmatprep.subr.bf16.mxu0 %v2831_v21  ;;  %358 = vmatprep.subr.bf16.mxu1 %v2833_v25  ;;  %v3226_v37 = vld [vmem:[#allocation8 + $0x224] ss:$16 sps:$4 sm:$0xff]   ;;  %v3221_v42 = vld [vmem:[#allocation8 + $0x20] ss:$16 sps:$4 sm:$0xff]  }
  0x66   :  { %v3223_v39 = vld [vmem:[#allocation8 + $0x24] ss:$16 sps:$4 sm:$0xff]   ;;  %v3230_v44 = vld [vmem:[#allocation8 + $0x240] ss:$16 sps:$4 sm:$0xff]  }
  0x67   :  { %2842 = vmatmul.mubr.msk.bf16.vlgmr.msra.gmra.mrb[0].mxu0 %vm231_vm0, %v92_v22  ;;  %2843 = vmatmul.mubr.msk.bf16.vlgmr.msra.gmra.mrb[0].mxu1 %vm231_vm0, %v92_v22  ;;  %v3232_v41 = vld [vmem:[#allocation8 + $0x244] ss:$16 sps:$4 sm:$0xff]   ;;  %v3227_v46 = vld [vmem:[#allocation8 + $0x40] ss:$16 sps:$4 sm:$0xff]  }
  0x68   :  { %318 = vmatpush1.bf16.msra.mxu0 %v2830_v27  ;;  %349 = vmatprep.mubr.bf16.mxu0 %v3862_v0  ;;  %v3229_v43 = vld [vmem:[#allocation8 + $0x44] ss:$16 sps:$4 sm:$0xff]   ;;  %v3236_v48 = vld [vmem:[#allocation8 + $0x260] ss:$16 sps:$4 sm:$0xff]  }
  0x69   :  { %319 = vmatprep.subr.bf16.mxu0 %v2839_v29  ;;  %359 = vmatpush1.bf16.msra.mxu1 %v2832_v30  ;;  %v3238_v45 = vld [vmem:[#allocation8 + $0x264] ss:$16 sps:$4 sm:$0xff]   ;;  %v3233_v50 = vld [vmem:[#allocation8 + $0x60] ss:$16 sps:$4 sm:$0xff]  }
  0x6a   :  { %390 = vmatprep.mubr.bf16.mxu1 %v3862_v0  ;;  %360 = vmatprep.subr.bf16.mxu1 %v2841_v31  ;;  %v3235_v47 = vld [vmem:[#allocation8 + $0x64] ss:$16 sps:$4 sm:$0xff]   ;;  %v3242_v52 = vld [vmem:[#allocation8 + $0x280] ss:$16 sps:$4 sm:$0xff]  }
  0x6b   :  { %v3244_v49 = vld [vmem:[#allocation8 + $0x284] ss:$16 sps:$4 sm:$0xff]   ;;  %v3239_v54 = vld [vmem:[#allocation8 + $0x80] ss:$16 sps:$4 sm:$0xff]  }
  0x6c   :  { %320 = vmatpush1.bf16.msra.mxu0 %v2838_v32  ;;  %v3241_v51 = vld [vmem:[#allocation8 + $0x84] ss:$16 sps:$4 sm:$0xff]   ;;  %v3248_v56 = vld [vmem:[#allocation8 + $0x2a0] ss:$16 sps:$4 sm:$0xff]  }
  0x6d   :  { %2014 = vmatprep.subr.bf16.mxu0 %v3220_v33  ;;  %361 = vmatpush1.bf16.msra.mxu1 %v2840_v34  ;;  %v3250_v53 = vld [vmem:[#allocation8 + $0x2a4] ss:$16 sps:$4 sm:$0xff]   ;;  %v3245_v58 = vld [vmem:[#allocation8 + $0xa0] ss:$16 sps:$4 sm:$0xff]  }
  0x6e   :  { %1973 = vmatprep.subr.bf16.mxu1 %v3217_v35  ;;  %v3247_v55 = vld [vmem:[#allocation8 + $0xa4] ss:$16 sps:$4 sm:$0xff]   ;;  %v3254_v60 = vld [vmem:[#allocation8 + $0x2c0] ss:$16 sps:$4 sm:$0xff]   ;;  %v3316_v35 = vld [vmem:[#allocation8 + $0xc] ss:$16 sps:$4 sm:$0xff]  }
  0x6f   :  { %2844 = vmatmul.mubr.msk.bf16.vlgmr.msra.gmra.mrb[4].mxu0 %vm231_vm0, %v92_v22  ;;  %v3256_v57 = vld [vmem:[#allocation8 + $0x2c4] ss:$16 sps:$4 sm:$0xff]   ;;  %v3251_v61 = vld [vmem:[#allocation8 + $0xc0] ss:$16 sps:$4 sm:$0xff]  }
  0x70   :  { %2015 = vmatpush1.bf16.msra.mxu0 %v3218_v36  ;;  %2845 = vmatmul.mubr.msk.bf16.vlgmr.msra.gmra.mrb[4].mxu1 %vm231_vm0, %v92_v22  ;;  %v3253_v59 = vld [vmem:[#allocation8 + $0xc4] ss:$16 sps:$4 sm:$0xff]   ;;  %v3260_v0 = vld [vmem:[#allocation8 + $0x2e0] ss:$16 sps:$4 sm:$0xff]   ;;  %v111_v36 = vlaneseq }
  0x71   :  { %2016 = vmatprep.subr.bf16.mxu0 %v3226_v37  ;;  %1974 = vmatpush1.bf16.msra.mxu1 %v3215_v38  ;;  %v3262_v62 = vld [vmem:[#allocation8 + $0x2e4] ss:$16 sps:$4 sm:$0xff]   ;;  %v3257_v2 = vld [vmem:[#allocation8 + $0xe0] ss:$16 sps:$4 sm:$0xff]  }
  0x72   :  { %1975 = vmatprep.subr.bf16.mxu1 %v3223_v39  ;;  %v3259_v63 = vld [vmem:[#allocation8 + $0xe4] ss:$16 sps:$4 sm:$0xff]   ;;  %v3266_v4 = vld [vmem:[#allocation8 + $0x300] ss:$16 sps:$4 sm:$0xff]   ;;  %v3968_v37 = vshrl.u32 %v111_v36, 7  ;;  %v3973_v39 = vld [vmem:[#allocation7] sm:$0xff] }
  0x73   :  { %v3268_v1 = vld [vmem:[#allocation8 + $0x304] ss:$16 sps:$4 sm:$0xff]   ;;  %v3263_v6 = vld [vmem:[#allocation8 + $0x100] ss:$16 sps:$4 sm:$0xff]   ;;  %v3344_v36 = vld [vmem:[#allocation8 + $0xa8] ss:$16 sps:$4 sm:$0xff]  }
  0x74   :  { %2017 = vmatpush1.bf16.msra.mxu0 %v3224_v40  ;;  %v3265_v3 = vld [vmem:[#allocation8 + $0x104] ss:$16 sps:$4 sm:$0xff]   ;;  %v3272_v8 = vld [vmem:[#allocation8 + $0x320] ss:$16 sps:$4 sm:$0xff]   ;;  %v3971_v38 = vsub.s32 0, %v3968_v37  ;;  %v121_v40 = vsub.s32 2, %v3968_v37 }
  0x75   :  { %2018 = vmatprep.subr.bf16.mxu0 %v3232_v41  ;;  %1976 = vmatpush1.bf16.msra.mxu1 %v3221_v42  ;;  %v3274_v5 = vld [vmem:[#allocation8 + $0x324] ss:$16 sps:$4 sm:$0xff]   ;;  %v3269_v10 = vld [vmem:[#allocation8 + $0x120] ss:$16 sps:$4 sm:$0xff]   ;;  %v3977_v41 = vsub.s32 1, %v3968_v37  ;;  %v125_v42 = vsub.s32 3, %v3968_v37 }
  0x76   :  { %1977 = vmatprep.subr.bf16.mxu1 %v3229_v43  ;;  %v3271_v7 = vld [vmem:[#allocation8 + $0x124] ss:$16 sps:$4 sm:$0xff]   ;;  %v3278_v12 = vld [vmem:[#allocation8 + $0x340] ss:$16 sps:$4 sm:$0xff]   ;;  %v114_v43 = vrot.slane %v3973_v39, %v3971_v38 }
  0x77   :  { %v3280_v9 = vld [vmem:[#allocation8 + $0x344] ss:$16 sps:$4 sm:$0xff]   ;;  %v3275_v14 = vld [vmem:[#allocation8 + $0x140] ss:$16 sps:$4 sm:$0xff]  }
  0x78   :  { %2019 = vmatpush1.bf16.msra.mxu0 %v3230_v44  ;;  %v3277_v11 = vld [vmem:[#allocation8 + $0x144] ss:$16 sps:$4 sm:$0xff]   ;;  %v3284_v16 = vld [vmem:[#allocation8 + $0x360] ss:$16 sps:$4 sm:$0xff]   ;;  %v122_v44 = vrot.slane %v3973_v39, %v121_v40 }
  0x79   :  { %2020 = vmatprep.subr.bf16.mxu0 %v3238_v45  ;;  %1978 = vmatpush1.bf16.msra.mxu1 %v3227_v46  ;;  %v3286_v13 = vld [vmem:[#allocation8 + $0x364] ss:$16 sps:$4 sm:$0xff]   ;;  %v3281_v18 = vld [vmem:[#allocation8 + $0x160] ss:$16 sps:$4 sm:$0xff]   ;;  %v118_v45 = vrot.slane %v3973_v39, %v3977_v41  ;;  %v126_v46 = vrot.slane %v3973_v39, %v125_v42 }
  0x7a   :  { %1979 = vmatprep.subr.bf16.mxu1 %v3235_v47  ;;  %v3283_v15 = vld [vmem:[#allocation8 + $0x164] ss:$16 sps:$4 sm:$0xff]   ;;  %v3290_v20 = vld [vmem:[#allocation8 + $0x380] ss:$16 sps:$4 sm:$0xff]  }
  0x7b   :  { %v3292_v17 = vld [vmem:[#allocation8 + $0x384] ss:$16 sps:$4 sm:$0xff]   ;;  %v3287_v22 = vld [vmem:[#allocation8 + $0x180] ss:$16 sps:$4 sm:$0xff]  }
  0x7c   :  { %2021 = vmatpush1.bf16.msra.mxu0 %v3236_v48  ;;  %v3289_v19 = vld [vmem:[#allocation8 + $0x184] ss:$16 sps:$4 sm:$0xff]   ;;  %v3296_v24 = vld [vmem:[#allocation8 + $0x3a0] ss:$16 sps:$4 sm:$0xff]  }
  0x7d   :  { %2022 = vmatprep.subr.bf16.mxu0 %v3244_v49  ;;  %1980 = vmatpush1.bf16.msra.mxu1 %v3233_v50  ;;  %v3298_v21 = vld [vmem:[#allocation8 + $0x3a4] ss:$16 sps:$4 sm:$0xff]   ;;  %v3293_v25 = vld [vmem:[#allocation8 + $0x1a0] ss:$16 sps:$4 sm:$0xff]  }
  0x7e   :  { %1981 = vmatprep.subr.bf16.mxu1 %v3241_v51  ;;  %v3295_v23 = vld [vmem:[#allocation8 + $0x1a4] ss:$16 sps:$4 sm:$0xff]   ;;  %v3299_v28 = vld [vmem:[#allocation8 + $0x1c0] ss:$16 sps:$4 sm:$0xff]  }
  0x7f   :  { %v3301_v26 = vld [vmem:[#allocation8 + $0x1c4] ss:$16 sps:$4 sm:$0xff]   ;;  %v3302_v29 = vld [vmem:[#allocation8 + $0x3c0] ss:$16 sps:$4 sm:$0xff]  }
  0x80   :  { %2023 = vmatpush1.bf16.msra.mxu0 %v3242_v52  ;;  %v3304_v27 = vld [vmem:[#allocation8 + $0x3c4] ss:$16 sps:$4 sm:$0xff]   ;;  %v3305_v32 = vld [vmem:[#allocation8 + $0x1e0] ss:$16 sps:$4 sm:$0xff]  }
  0x81   :  { %2024 = vmatprep.subr.bf16.mxu0 %v3250_v53  ;;  %1982 = vmatpush1.bf16.msra.mxu1 %v3239_v54  ;;  %v3307_v30 = vld [vmem:[#allocation8 + $0x1e4] ss:$16 sps:$4 sm:$0xff]   ;;  %v3308_v33 = vld [vmem:[#allocation8 + $0x3e0] ss:$16 sps:$4 sm:$0xff]  }
  0x82   :  { %1983 = vmatprep.subr.bf16.mxu1 %v3247_v55  ;;  %v3310_v31 = vld [vmem:[#allocation8 + $0x3e4] ss:$16 sps:$4 sm:$0xff]   ;;  %v133_v55 = vsub.s32 5, %v3968_v37 }
  0x83   :  { %v3313_v34 = vld [vmem:[#allocation8 + $0x404] ss:$16 sps:$4 sm:$0xff]  }
  0x84   :  { %2025 = vmatpush1.bf16.msra.mxu0 %v3248_v56 }
  0x85   :  { %2026 = vmatprep.subr.bf16.mxu0 %v3256_v57  ;;  %1984 = vmatpush1.bf16.msra.mxu1 %v3245_v58 }
  0x86   :  { %1985 = vmatprep.subr.bf16.mxu1 %v3253_v59 }
  0x88   :  { %2027 = vmatpush1.bf16.msra.mxu0 %v3254_v60 }
  0x89   :  { %2028 = vmatprep.subr.bf16.mxu0 %v3262_v62  ;;  %1986 = vmatpush1.bf16.msra.mxu1 %v3251_v61 }
  0x8a   :  { %1987 = vmatprep.subr.bf16.mxu1 %v3259_v63 }
  0x8c   :  { %2029 = vmatpush1.bf16.msra.mxu0 %v3260_v0 }
  0x8d   :  { %2030 = vmatprep.subr.bf16.mxu0 %v3268_v1  ;;  %1988 = vmatpush1.bf16.msra.mxu1 %v3257_v2  ;;  %v3314_v2 = vld [vmem:[#allocation8 + $0x8] ss:$16 sps:$4 sm:$0xff]  }
  0x8e   :  { %1989 = vmatprep.subr.bf16.mxu1 %v3265_v3  ;;  %v134_v3 = vrot.slane %v3973_v39, %v133_v55  ;;  %v3359_v55 = vld [vmem:[#allocation8 + $0x500] ss:$16 sps:$4 sm:$0xff]  }
  0x90   :  { %2031 = vmatpush1.bf16.msra.mxu0 %v3266_v4 }
  0x91   :  { %2032 = vmatprep.subr.bf16.mxu0 %v3274_v5  ;;  %1990 = vmatpush1.bf16.msra.mxu1 %v3263_v6  ;;  %v3311_v6 = vld [vmem:[#allocation8 + $0x400] ss:$16 sps:$4 sm:$0xff]  }
  0x92   :  { %1991 = vmatprep.subr.bf16.mxu1 %v3271_v7  ;;  %v3319_v7 = vld [vmem:[#allocation8 + $0x424] ss:$16 sps:$4 sm:$0xff]  }
  0x94   :  { %2033 = vmatpush1.bf16.msra.mxu0 %v3272_v8  ;;  %v3322_v8 = vld [vmem:[#allocation8 + $0x2c] ss:$16 sps:$4 sm:$0xff]  }
  0x95   :  { %2034 = vmatprep.subr.bf16.mxu0 %v3280_v9  ;;  %1992 = vmatpush1.bf16.msra.mxu1 %v3269_v10 }
  0x96   :  { %1993 = vmatprep.subr.bf16.mxu1 %v3277_v11  ;;  %v3320_v11 = vld [vmem:[#allocation8 + $0x28] ss:$16 sps:$4 sm:$0xff]  }
  0x98   :  { %2035 = vmatpush1.bf16.msra.mxu0 %v3278_v12 }
  0x99   :  { %2036 = vmatprep.subr.bf16.mxu0 %v3286_v13  ;;  %1994 = vmatpush1.bf16.msra.mxu1 %v3275_v14 }
  0x9a   :  { %1995 = vmatprep.subr.bf16.mxu1 %v3283_v15  ;;  %v3317_v15 = vld [vmem:[#allocation8 + $0x420] ss:$16 sps:$4 sm:$0xff]  }
  0x9c   :  { %2037 = vmatpush1.bf16.msra.mxu0 %v3284_v16  ;;  %v3328_v16 = vld [vmem:[#allocation8 + $0x4c] ss:$16 sps:$4 sm:$0xff]  }
  0x9d   :  { %2038 = vmatprep.subr.bf16.mxu0 %v3292_v17  ;;  %1996 = vmatpush1.bf16.msra.mxu1 %v3281_v18 }
  0x9e   :  { %1997 = vmatprep.subr.bf16.mxu1 %v3289_v19  ;;  %v3325_v19 = vld [vmem:[#allocation8 + $0x444] ss:$16 sps:$4 sm:$0xff]  }
  0xa0   :  { %2039 = vmatpush1.bf16.msra.mxu0 %v3290_v20 }
  0xa1   :  { %2040 = vmatprep.subr.bf16.mxu0 %v3298_v21  ;;  %1998 = vmatpush1.bf16.msra.mxu1 %v3287_v22 }
  0xa2   :  { %1999 = vmatprep.subr.bf16.mxu1 %v3295_v23  ;;  %v3326_v23 = vld [vmem:[#allocation8 + $0x48] ss:$16 sps:$4 sm:$0xff]  }
  0xa4   :  { %2041 = vmatpush1.bf16.msra.mxu0 %v3296_v24 }
  0xa5   :  { %2000 = vmatpush1.bf16.msra.mxu1 %v3293_v25  ;;  %2042 = vmatprep.subr.bf16.mxu0 %v3304_v27  ;;  %v3323_v25 = vld [vmem:[#allocation8 + $0x440] ss:$16 sps:$4 sm:$0xff]   ;;  %v3331_v27 = vld [vmem:[#allocation8 + $0x464] ss:$16 sps:$4 sm:$0xff]  }
  0xa6   :  { %2001 = vmatprep.subr.bf16.mxu1 %v3301_v26  ;;  %v3334_v26 = vld [vmem:[#allocation8 + $0x6c] ss:$16 sps:$4 sm:$0xff]  }
  0xa8   :  { %2043 = vmatpush1.bf16.msra.mxu0 %v3302_v29  ;;  %v3329_v29 = vld [vmem:[#allocation8 + $0x460] ss:$16 sps:$4 sm:$0xff]  }
  0xa9   :  { %2002 = vmatpush1.bf16.msra.mxu1 %v3299_v28  ;;  %2044 = vmatprep.subr.bf16.mxu0 %v3310_v31  ;;  %v3332_v28 = vld [vmem:[#allocation8 + $0x68] ss:$16 sps:$4 sm:$0xff]   ;;  %v3337_v31 = vld [vmem:[#allocation8 + $0x484] ss:$16 sps:$4 sm:$0xff]  }
  0xaa   :  { %2003 = vmatprep.subr.bf16.mxu1 %v3307_v30  ;;  %v3340_v30 = vld [vmem:[#allocation8 + $0x8c] ss:$16 sps:$4 sm:$0xff]  }
  0xac   :  { %2045 = vmatpush1.bf16.msra.mxu0 %v3308_v33  ;;  %v3335_v33 = vld [vmem:[#allocation8 + $0x480] ss:$16 sps:$4 sm:$0xff]  }
  0xad   :  { %2004 = vmatpush1.bf16.msra.mxu1 %v3305_v32  ;;  %2055 = vmatprep.subr.bf16.mxu0 %v3313_v34  ;;  %v3338_v32 = vld [vmem:[#allocation8 + $0x88] ss:$16 sps:$4 sm:$0xff]   ;;  %v3346_v34 = vld [vmem:[#allocation8 + $0xac] ss:$16 sps:$4 sm:$0xff]  }
  0xae   :  { %2137 = vmatprep.subr.bf16.mxu1 %v3316_v35  ;;  %v3343_v35 = vld [vmem:[#allocation8 + $0x4a4] ss:$16 sps:$4 sm:$0xff]  }
 0x13a   :  { %v269_v47 = vpop.f32.mrb[0].mxu0  ;;  %v310_v49 = vpop.f32.mrb[0].mxu1 }
 0x13b   :  { %v270_v48 = vadd.f32 %v269_v47, %v114_v43  ;;  %v271_v50 = vpop.f32.mrb[1].mxu0  ;;  %v311_v51 = vadd.f32 %v310_v49, %v122_v44  ;;  %v312_v53 = vpop.f32.mrb[1].mxu1  ;;  %v3341_v43 = vld [vmem:[#allocation8 + $0x4a0] ss:$16 sps:$4 sm:$0xff]   ;;  %v3352_v44 = vld [vmem:[#allocation8 + $0xcc] ss:$16 sps:$4 sm:$0xff]  }
 0x13c   :  { %v272_v52 = vadd.f32 %v271_v50, %v118_v45  ;;  %v273_v54 = vpop.f32.mrb[2].mxu0  ;;  %v313_v57 = vadd.f32 %v312_v53, %v126_v46  ;;  %v314_v59 = vpop.f32.mrb[2].mxu1  ;;  %v3349_v45 = vld [vmem:[#allocation8 + $0x4c4] ss:$16 sps:$4 sm:$0xff]   ;;  %v3350_v46 = vld [vmem:[#allocation8 + $0xc8] ss:$16 sps:$4 sm:$0xff]  }
 0x13d   :  { %v399_v56 = vmax.f32 %v270_v48, 0.0  ;;  %v274_v58 = vpop.f32.mrb[3].mxu0  ;;  %v401_v60 = vmax.f32 %v311_v51, 0.0  ;;  %v315_v62 = vpop.f32.mrb[3].mxu1  ;;  %v3347_v47 = vld [vmem:[#allocation8 + $0x4c0] ss:$16 sps:$4 sm:$0xff]  }
 0x13e   :  { %v400_v61 = vmax.f32 %v272_v52, 0.0  ;;  %v402_v63 = vmax.f32 %v313_v57, 0.0  ;;  %v3358_v48 = vld [vmem:[#allocation8 + $0xec] ss:$16 sps:$4 sm:$0xff]   ;;  %v3355_v49 = vld [vmem:[#allocation8 + $0x4e4] ss:$16 sps:$4 sm:$0xff]  }
 0x13f   :  { %v3991_v0 = vpack.c.bf16 %v401_v60, %v401_v60  ;;  %v3994_v4 = vpack.c.bf16 %v399_v56, %v399_v56  ;;  %v3356_v50 = vld [vmem:[#allocation8 + $0xe8] ss:$16 sps:$4 sm:$0xff]   ;;  %v3353_v51 = vld [vmem:[#allocation8 + $0x4e0] ss:$16 sps:$4 sm:$0xff]   ;;  %v3364_v52 = vld [vmem:[#allocation8 + $0x10c] ss:$16 sps:$4 sm:$0xff]  }
 0x140   :  { %v408_v1 = vpack.c.bf16 %v400_v61, %v400_v61  ;;  %v3996_v5 = vpack.c.bf16 %v402_v63, %v402_v63  ;;  %v3361_v53 = vld [vmem:[#allocation8 + $0x504] ss:$16 sps:$4 sm:$0xff]   ;;  %v3362_v54 = vld [vmem:[#allocation8 + $0x108] ss:$16 sps:$4 sm:$0xff]   ;;  %v3370_v56 = vld [vmem:[#allocation8 + $0x12c] ss:$16 sps:$4 sm:$0xff]  }
 0x141   :  { %v3367_v57 = vld [vmem:[#allocation8 + $0x524] ss:$16 sps:$4 sm:$0xff]   ;;  %v3368_v58 = vld [vmem:[#allocation8 + $0x128] ss:$16 sps:$4 sm:$0xff]   ;;  %v3365_v59 = vld [vmem:[#allocation8 + $0x520] ss:$16 sps:$4 sm:$0xff]  }
 0x142   :  { %2005 = vmatprep.mubr.bf16.mxu1 %v408_v1  ;;  %v3998_v9 = vpop.f32.mrb[4].mxu0  ;;  %2046 = vmatprep.mubr.bf16.mxu0 %v3996_v5  ;;  %v3376_v60 = vld [vmem:[#allocation8 + $0x14c] ss:$16 sps:$4 sm:$0xff]   ;;  %v3373_v61 = vld [vmem:[#allocation8 + $0x544] ss:$16 sps:$4 sm:$0xff]  }
 0x143   :  { %2006 = vmatmul.mubr.bf16.vlgmr.msra.gmra.mrb[8].mxu1 %v3994_v4  ;;  %v353_v10 = vpop.f32.mrb[5].mxu0  ;;  %2047 = vmatmul.mubr.bf16.vlgmr.msra.gmra.mrb[8].mxu0 %v3991_v0  ;;  %v4003_v13 = vpop.f32.mrb[4].mxu1  ;;  %v3374_v62 = vld [vmem:[#allocation8 + $0x148] ss:$16 sps:$4 sm:$0xff]   ;;  %v3371_v63 = vld [vmem:[#allocation8 + $0x540] ss:$16 sps:$4 sm:$0xff]  }
 0x144   :  { %2138 = vmatpush1.bf16.msra.mxu1 %v3314_v2  ;;  %v354_v12 = vadd.f32 %v353_v10, %v134_v3  ;;  %v355_v14 = vpop.f32.mrb[6].mxu0  ;;  %2056 = vmatpush1.bf16.msra.mxu0 %v3311_v6  ;;  %v4005_v17 = vpop.f32.mrb[5].mxu1  ;;  %v3379_v2 = vld [vmem:[#allocation8 + $0x564] ss:$16 sps:$4 sm:$0xff]   ;;  %v3380_v3 = vld [vmem:[#allocation8 + $0x168] ss:$16 sps:$4 sm:$0xff]  }
 0x145   :  { %2169 = vmatprep.mubr.bf16.mxu1 %v408_v1  ;;  %v356_v18 = vpop.f32.mrb[7].mxu0  ;;  %2057 = vmatprep.subr.bf16.mxu0 %v3319_v7  ;;  %v396_v21 = vpop.f32.mrb[6].mxu1  ;;  %v3382_v1 = vld [vmem:[#allocation8 + $0x16c] ss:$16 sps:$4 sm:$0xff]   ;;  %v3377_v6 = vld [vmem:[#allocation8 + $0x560] ss:$16 sps:$4 sm:$0xff]  }
 0x146   :  { %2139 = vmatprep.subr.bf16.mxu1 %v3322_v8  ;;  %v404_v20 = vmax.f32 %v354_v12, 0.0  ;;  %v397_v22 = vpop.f32.mrb[7].mxu1  ;;  %v3388_v7 = vld [vmem:[#allocation8 + $0x18c] ss:$16 sps:$4 sm:$0xff]   ;;  %v3385_v8 = vld [vmem:[#allocation8 + $0x584] ss:$16 sps:$4 sm:$0xff]  }
 0x147   :  { %v3386_v10 = vld [vmem:[#allocation8 + $0x188] ss:$16 sps:$4 sm:$0xff]   ;;  %v3383_v12 = vld [vmem:[#allocation8 + $0x580] ss:$16 sps:$4 sm:$0xff]   ;;  %v3394_v14 = vld [vmem:[#allocation8 + $0x1ac] ss:$16 sps:$4 sm:$0xff]  }
 0x148   :  { %2140 = vmatpush1.bf16.msra.mxu1 %v3320_v11  ;;  %v4007_v24 = vpack.c.bf16 %v404_v20, %v404_v20  ;;  %2058 = vmatpush1.bf16.msra.mxu0 %v3317_v15  ;;  %v129_v11 = vsub.s32 4, %v3968_v37  ;;  %v3391_v15 = vld [vmem:[#allocation8 + $0x5a4] ss:$16 sps:$4 sm:$0xff]   ;;  %v3392_v18 = vld [vmem:[#allocation8 + $0x1a8] ss:$16 sps:$4 sm:$0xff]  }
 0x149   :  { %2141 = vmatprep.subr.bf16.mxu1 %v3328_v16  ;;  %2059 = vmatprep.subr.bf16.mxu0 %v3325_v19  ;;  %v141_v16 = vsub.s32 7, %v3968_v37  ;;  %v3389_v20 = vld [vmem:[#allocation8 + $0x5a0] ss:$16 sps:$4 sm:$0xff]   ;;  %v3400_v21 = vld [vmem:[#allocation8 + $0x1cc] ss:$16 sps:$4 sm:$0xff]  }
 0x14a   :  { %2087 = vmatprep.mubr.bf16.mxu0 %v4007_v24  ;;  %v130_v19 = vrot.slane %v3973_v39, %v129_v11  ;;  %v3397_v22 = vld [vmem:[#allocation8 + $0x5c4] ss:$16 sps:$4 sm:$0xff]   ;;  %v3460_v11 = vld [vmem:[#allocation8 + $0x30c] ss:$16 sps:$4 sm:$0xff]  }
 0x14c   :  { %2142 = vmatpush1.bf16.msra.mxu1 %v3326_v23  ;;  %2060 = vmatpush1.bf16.msra.mxu0 %v3323_v25  ;;  %v142_v23 = vrot.slane %v3973_v39, %v141_v16  ;;  %v352_v25 = vadd.f32 %v3998_v9, %v130_v19  ;;  %v3466_v16 = vld [vmem:[#allocation8 + $0x32c] ss:$16 sps:$4 sm:$0xff]   ;;  %v3464_v19 = vld [vmem:[#allocation8 + $0x328] ss:$16 sps:$4 sm:$0xff]  }
 0x14d   :  { %2143 = vmatprep.subr.bf16.mxu1 %v3334_v26  ;;  %2061 = vmatprep.subr.bf16.mxu0 %v3331_v27  ;;  %v3398_v26 = vld [vmem:[#allocation8 + $0x1c8] ss:$16 sps:$4 sm:$0xff]   ;;  %v3395_v27 = vld [vmem:[#allocation8 + $0x5c0] ss:$16 sps:$4 sm:$0xff]  }
 0x150   :  { %2144 = vmatpush1.bf16.msra.mxu1 %v3332_v28  ;;  %2062 = vmatpush1.bf16.msra.mxu0 %v3329_v29  ;;  %v3406_v28 = vld [vmem:[#allocation8 + $0x1ec] ss:$16 sps:$4 sm:$0xff]   ;;  %v3403_v29 = vld [vmem:[#allocation8 + $0x5e4] ss:$16 sps:$4 sm:$0xff]  }
 0x151   :  { %2145 = vmatprep.subr.bf16.mxu1 %v3340_v30  ;;  %2063 = vmatprep.subr.bf16.mxu0 %v3337_v31  ;;  %v395_v30 = vadd.f32 %v4005_v17, %v142_v23  ;;  %v403_v31 = vmax.f32 %v352_v25, 0.0  ;;  %v3418_v17 = vld [vmem:[#allocation8 + $0x22c] ss:$16 sps:$4 sm:$0xff]   ;;  %v3470_v23 = vld [vmem:[#allocation8 + $0x348] ss:$16 sps:$4 sm:$0xff]  }
 0x152   :  { %v3467_v25 = vld [vmem:[#allocation8 + $0x740] ss:$16 sps:$4 sm:$0xff]  }
 0x153   :  { %v4016_v9 = vpack.c.bf16 %v403_v31, %v403_v31  ;;  %v3481_v31 = vld [vmem:[#allocation8 + $0x784] ss:$16 sps:$4 sm:$0xff]  }
 0x154   :  { %2146 = vmatpush1.bf16.msra.mxu1 %v3338_v32  ;;  %2064 = vmatpush1.bf16.msra.mxu0 %v3335_v33  ;;  %v3404_v32 = vld [vmem:[#allocation8 + $0x1e8] ss:$16 sps:$4 sm:$0xff]   ;;  %v3401_v33 = vld [vmem:[#allocation8 + $0x5e0] ss:$16 sps:$4 sm:$0xff]  }
 0x155   :  { %2147 = vmatprep.subr.bf16.mxu1 %v3346_v34  ;;  %2065 = vmatprep.subr.bf16.mxu0 %v3343_v35  ;;  %v3412_v34 = vld [vmem:[#allocation8 + $0x20c] ss:$16 sps:$4 sm:$0xff]   ;;  %v3409_v35 = vld [vmem:[#allocation8 + $0x604] ss:$16 sps:$4 sm:$0xff]  }
 0x158   :  { %2148 = vmatpush1.bf16.msra.mxu1 %v3344_v36  ;;  %2066 = vmatpush1.bf16.msra.mxu0 %v3341_v43  ;;  %v406_v36 = vmax.f32 %v395_v30, 0.0  ;;  %v3410_v43 = vld [vmem:[#allocation8 + $0x208] ss:$16 sps:$4 sm:$0xff]   ;;  %v3484_v30 = vld [vmem:[#allocation8 + $0x38c] ss:$16 sps:$4 sm:$0xff]  }
 0x159   :  { %2149 = vmatprep.subr.bf16.mxu1 %v3352_v44  ;;  %2067 = vmatprep.subr.bf16.mxu0 %v3349_v45  ;;  %v3407_v44 = vld [vmem:[#allocation8 + $0x600] ss:$16 sps:$4 sm:$0xff]   ;;  %v3415_v45 = vld [vmem:[#allocation8 + $0x624] ss:$16 sps:$4 sm:$0xff]  }
 0x15c   :  { %2150 = vmatpush1.bf16.msra.mxu1 %v3350_v46  ;;  %2068 = vmatpush1.bf16.msra.mxu0 %v3347_v47  ;;  %v4019_v46 = vpack.c.bf16 %v406_v36, %v406_v36  ;;  %v3416_v47 = vld [vmem:[#allocation8 + $0x228] ss:$16 sps:$4 sm:$0xff]   ;;  %v3487_v36 = vld [vmem:[#allocation8 + $0x7a4] ss:$16 sps:$4 sm:$0xff]  }
 0x15d   :  { %2151 = vmatprep.subr.bf16.mxu1 %v3358_v48  ;;  %2069 = vmatprep.subr.bf16.mxu0 %v3355_v49  ;;  %v3413_v48 = vld [vmem:[#allocation8 + $0x620] ss:$16 sps:$4 sm:$0xff]   ;;  %v3424_v49 = vld [vmem:[#allocation8 + $0x24c] ss:$16 sps:$4 sm:$0xff]  }
 0x160   :  { %2152 = vmatpush1.bf16.msra.mxu1 %v3356_v50  ;;  %2070 = vmatpush1.bf16.msra.mxu0 %v3353_v51  ;;  %v3421_v50 = vld [vmem:[#allocation8 + $0x644] ss:$16 sps:$4 sm:$0xff]   ;;  %v3422_v51 = vld [vmem:[#allocation8 + $0x248] ss:$16 sps:$4 sm:$0xff]  }
 0x161   :  { %2153 = vmatprep.subr.bf16.mxu1 %v3364_v52  ;;  %2071 = vmatprep.subr.bf16.mxu0 %v3361_v53  ;;  %v3430_v52 = vld [vmem:[#allocation8 + $0x26c] ss:$16 sps:$4 sm:$0xff]   ;;  %v3427_v53 = vld [vmem:[#allocation8 + $0x664] ss:$16 sps:$4 sm:$0xff]  }
 0x164   :  { %2154 = vmatpush1.bf16.msra.mxu1 %v3362_v54  ;;  %2072 = vmatpush1.bf16.msra.mxu0 %v3359_v55  ;;  %v3428_v54 = vld [vmem:[#allocation8 + $0x268] ss:$16 sps:$4 sm:$0xff]   ;;  %v3425_v55 = vld [vmem:[#allocation8 + $0x660] ss:$16 sps:$4 sm:$0xff]  }
 0x165   :  { %2155 = vmatprep.subr.bf16.mxu1 %v3370_v56  ;;  %2073 = vmatprep.subr.bf16.mxu0 %v3367_v57  ;;  %v3433_v56 = vld [vmem:[#allocation8 + $0x684] ss:$16 sps:$4 sm:$0xff]   ;;  %v3434_v57 = vld [vmem:[#allocation8 + $0x288] ss:$16 sps:$4 sm:$0xff]  }
 0x168   :  { %2156 = vmatpush1.bf16.msra.mxu1 %v3368_v58  ;;  %2074 = vmatpush1.bf16.msra.mxu0 %v3365_v59  ;;  %v3431_v58 = vld [vmem:[#allocation8 + $0x680] ss:$16 sps:$4 sm:$0xff]   ;;  %v3442_v59 = vld [vmem:[#allocation8 + $0x2ac] ss:$16 sps:$4 sm:$0xff]  }
 0x169   :  { %2157 = vmatprep.subr.bf16.mxu1 %v3376_v60  ;;  %2075 = vmatprep.subr.bf16.mxu0 %v3373_v61  ;;  %v3439_v60 = vld [vmem:[#allocation8 + $0x6a4] ss:$16 sps:$4 sm:$0xff]   ;;  %v3440_v61 = vld [vmem:[#allocation8 + $0x2a8] ss:$16 sps:$4 sm:$0xff]  }
 0x16c   :  { %2158 = vmatpush1.bf16.msra.mxu1 %v3374_v62  ;;  %2076 = vmatpush1.bf16.msra.mxu0 %v3371_v63  ;;  %v3437_v62 = vld [vmem:[#allocation8 + $0x6a0] ss:$16 sps:$4 sm:$0xff]   ;;  %v3448_v63 = vld [vmem:[#allocation8 + $0x2cc] ss:$16 sps:$4 sm:$0xff]  }
 0x16d   :  { %2159 = vmatprep.subr.bf16.mxu1 %v3382_v1  ;;  %2077 = vmatprep.subr.bf16.mxu0 %v3379_v2  ;;  %v3445_v1 = vld [vmem:[#allocation8 + $0x6c4] ss:$16 sps:$4 sm:$0xff]   ;;  %v3446_v2 = vld [vmem:[#allocation8 + $0x2c8] ss:$16 sps:$4 sm:$0xff]  }
 0x170   :  { %2160 = vmatpush1.bf16.msra.mxu1 %v3380_v3  ;;  %2078 = vmatpush1.bf16.msra.mxu0 %v3377_v6  ;;  %v3443_v3 = vld [vmem:[#allocation8 + $0x6c0] ss:$16 sps:$4 sm:$0xff]   ;;  %v3454_v6 = vld [vmem:[#allocation8 + $0x2ec] ss:$16 sps:$4 sm:$0xff]  }
 0x171   :  { %2161 = vmatprep.subr.bf16.mxu1 %v3388_v7  ;;  %2079 = vmatprep.subr.bf16.mxu0 %v3385_v8  ;;  %v3451_v7 = vld [vmem:[#allocation8 + $0x6e4] ss:$16 sps:$4 sm:$0xff]   ;;  %v3452_v8 = vld [vmem:[#allocation8 + $0x2e8] ss:$16 sps:$4 sm:$0xff]  }
 0x174   :  { %2162 = vmatpush1.bf16.msra.mxu1 %v3386_v10  ;;  %2080 = vmatpush1.bf16.msra.mxu0 %v3383_v12  ;;  %v3449_v10 = vld [vmem:[#allocation8 + $0x6e0] ss:$16 sps:$4 sm:$0xff]   ;;  %v3457_v12 = vld [vmem:[#allocation8 + $0x704] ss:$16 sps:$4 sm:$0xff]  }
 0x175   :  { %2163 = vmatprep.subr.bf16.mxu1 %v3394_v14  ;;  %2081 = vmatprep.subr.bf16.mxu0 %v3391_v15  ;;  %v3458_v14 = vld [vmem:[#allocation8 + $0x308] ss:$16 sps:$4 sm:$0xff]   ;;  %v3455_v15 = vld [vmem:[#allocation8 + $0x700] ss:$16 sps:$4 sm:$0xff]  }
 0x178   :  { %2164 = vmatpush1.bf16.msra.mxu1 %v3392_v18  ;;  %2082 = vmatpush1.bf16.msra.mxu0 %v3389_v20  ;;  %v3463_v18 = vld [vmem:[#allocation8 + $0x724] ss:$16 sps:$4 sm:$0xff]   ;;  %v3461_v20 = vld [vmem:[#allocation8 + $0x720] ss:$16 sps:$4 sm:$0xff]  }
 0x179   :  { %2165 = vmatprep.subr.bf16.mxu1 %v3400_v21  ;;  %2083 = vmatprep.subr.bf16.mxu0 %v3397_v22  ;;  %v3472_v21 = vld [vmem:[#allocation8 + $0x34c] ss:$16 sps:$4 sm:$0xff]   ;;  %v3469_v22 = vld [vmem:[#allocation8 + $0x744] ss:$16 sps:$4 sm:$0xff]  }
 0x17c   :  { %2166 = vmatpush1.bf16.msra.mxu1 %v3398_v26  ;;  %2084 = vmatpush1.bf16.msra.mxu0 %v3395_v27  ;;  %v3478_v26 = vld [vmem:[#allocation8 + $0x36c] ss:$16 sps:$4 sm:$0xff]   ;;  %v3475_v27 = vld [vmem:[#allocation8 + $0x764] ss:$16 sps:$4 sm:$0xff]  }
 0x17d   :  { %2167 = vmatprep.subr.bf16.mxu1 %v3406_v28  ;;  %2085 = vmatprep.subr.bf16.mxu0 %v3403_v29  ;;  %v3476_v28 = vld [vmem:[#allocation8 + $0x368] ss:$16 sps:$4 sm:$0xff]   ;;  %v3473_v29 = vld [vmem:[#allocation8 + $0x760] ss:$16 sps:$4 sm:$0xff]  }
 0x180   :  { %2168 = vmatpush1.bf16.msra.mxu1 %v3404_v32  ;;  %2086 = vmatpush1.bf16.msra.mxu0 %v3401_v33  ;;  %v3482_v32 = vld [vmem:[#allocation8 + $0x388] ss:$16 sps:$4 sm:$0xff]   ;;  %v137_v33 = vsub.s32 6, %v3968_v37 }
 0x181   :  { %2178 = vmatprep.subr.bf16.mxu1 %v3412_v34  ;;  %2096 = vmatprep.subr.bf16.mxu0 %v3409_v35  ;;  %v3479_v34 = vld [vmem:[#allocation8 + $0x780] ss:$16 sps:$4 sm:$0xff]   ;;  %v3490_v35 = vld [vmem:[#allocation8 + $0x3ac] ss:$16 sps:$4 sm:$0xff]  }
 0x183   :  { %2170 = vmatmul.mubr.bf16.vlgmr.msra.gmra.mrb[12].mxu1 %v3994_v4  ;;  %2088 = vmatmul.mubr.bf16.vlgmr.msra.gmra.mrb[8].mxu0 %v4016_v9  ;;  %v3419_v4 = vld [vmem:[#allocation8 + $0x640] ss:$16 sps:$4 sm:$0xff]  }
 0x184   :  { %2179 = vmatpush1.bf16.msra.mxu1 %v3410_v43  ;;  %2097 = vmatpush1.bf16.msra.mxu0 %v3407_v44  ;;  %v3488_v43 = vld [vmem:[#allocation8 + $0x3a8] ss:$16 sps:$4 sm:$0xff]   ;;  %v138_v44 = vrot.slane %v3973_v39, %v137_v33  ;;  %v3497_v39 = vld [vmem:[#allocation8 + $0x7e0] ss:$16 sps:$4 sm:$0xff]  }
 0x185   :  { %2210 = vmatprep.mubr.bf16.mxu1 %v3996_v5  ;;  %2098 = vmatprep.subr.bf16.mxu0 %v3415_v45  ;;  %v3436_v5 = vld [vmem:[#allocation8 + $0x28c] ss:$16 sps:$4 sm:$0xff]   ;;  %v3485_v45 = vld [vmem:[#allocation8 + $0x7a0] ss:$16 sps:$4 sm:$0xff]   ;;  %v3536_v33 = vld [vmem:[#allocation8 + $0x568] ss:$16 sps:$4 sm:$0xff]  }
 0x186   :  { %2180 = vmatprep.subr.bf16.mxu1 %v3418_v17  ;;  %2128 = vmatprep.mubr.bf16.mxu0 %v4019_v46  ;;  %v3496_v17 = vld [vmem:[#allocation8 + $0x3cc] ss:$16 sps:$4 sm:$0xff]  }
 0x188   :  { %2181 = vmatpush1.bf16.msra.mxu1 %v3416_v47  ;;  %2099 = vmatpush1.bf16.msra.mxu0 %v3413_v48  ;;  %v3493_v47 = vld [vmem:[#allocation8 + $0x7c4] ss:$16 sps:$4 sm:$0xff]   ;;  %v393_v48 = vadd.f32 %v4003_v13, %v138_v44  ;;  %v3508_v13 = vld [vmem:[#allocation8 + $0x42c] ss:$16 sps:$4 sm:$0xff]  }
 0x189   :  { %2182 = vmatprep.subr.bf16.mxu1 %v3424_v49  ;;  %2100 = vmatprep.subr.bf16.mxu0 %v3421_v50  ;;  %v3494_v49 = vld [vmem:[#allocation8 + $0x3c8] ss:$16 sps:$4 sm:$0xff]   ;;  %v3491_v50 = vld [vmem:[#allocation8 + $0x7c0] ss:$16 sps:$4 sm:$0xff]   ;;  %v3547_v44 = vld [vmem:[#allocation8 + $0x5cc] ss:$16 sps:$4 sm:$0xff]  }
 0x18c   :  { %2183 = vmatpush1.bf16.msra.mxu1 %v3422_v51  ;;  %2101 = vmatpush1.bf16.msra.mxu0 %v3419_v4  ;;  %v3502_v51 = vld [vmem:[#allocation8 + $0x3ec] ss:$16 sps:$4 sm:$0xff]   ;;  %v3499_v4 = vld [vmem:[#allocation8 + $0x7e4] ss:$16 sps:$4 sm:$0xff]  }
 0x18d   :  { %2184 = vmatprep.subr.bf16.mxu1 %v3430_v52  ;;  %2102 = vmatprep.subr.bf16.mxu0 %v3427_v53  ;;  %v405_v52 = vmax.f32 %v393_v48, 0.0  ;;  %v3500_v53 = vld [vmem:[#allocation8 + $0x3e8] ss:$16 sps:$4 sm:$0xff]   ;;  %v3553_v48 = vld [vmem:[#allocation8 + $0x60c] ss:$16 sps:$4 sm:$0xff]  }
 0x190   :  { %2185 = vmatpush1.bf16.msra.mxu1 %v3428_v54  ;;  %2103 = vmatpush1.bf16.msra.mxu0 %v3425_v55  ;;  %v3505_v54 = vld [vmem:[#allocation8 + $0x40c] ss:$16 sps:$4 sm:$0xff]   ;;  %v4027_v55 = vpack.c.bf16 %v405_v52, %v405_v52  ;;  %v3557_v52 = vld [vmem:[#allocation8 + $0x648] ss:$16 sps:$4 sm:$0xff]  }
 0x191   :  { %2186 = vmatprep.subr.bf16.mxu1 %v3436_v5  ;;  %2104 = vmatprep.subr.bf16.mxu0 %v3433_v56  ;;  %v3503_v5 = vld [vmem:[#allocation8 + $0x408] ss:$16 sps:$4 sm:$0xff]  }
 0x192   :  { %v3599_v56 = vld [vmem:[#allocation10] ss:$8 sps:$4 sm:$0xff]  }
 0x194   :  { %2187 = vmatpush1.bf16.msra.mxu1 %v3434_v57  ;;  %2105 = vmatpush1.bf16.msra.mxu0 %v3431_v58  ;;  %v3601_v57 = vld [vmem:[#allocation10 + $0x4] ss:$8 sps:$4 sm:$0xff]   ;;  %v3506_v58 = vld [vmem:[#allocation8 + $0x428] ss:$16 sps:$4 sm:$0xff]  }
 0x195   :  { %2188 = vmatprep.subr.bf16.mxu1 %v3442_v59  ;;  %2106 = vmatprep.subr.bf16.mxu0 %v3439_v60  ;;  %v3604_v59 = vld [vmem:[#allocation10 + $0x14] ss:$8 sps:$4 sm:$0xff]  }
 0x196   :  { %v3511_v60 = vld [vmem:[#allocation8 + $0x44c] ss:$16 sps:$4 sm:$0xff]  }
 0x198   :  { %2189 = vmatpush1.bf16.msra.mxu1 %v3440_v61  ;;  %2107 = vmatpush1.bf16.msra.mxu0 %v3437_v62  ;;  %v3602_v61 = vld [vmem:[#allocation10 + $0x10] ss:$8 sps:$4 sm:$0xff]  }
 0x199   :  { %2190 = vmatprep.subr.bf16.mxu1 %v3448_v63  ;;  %2108 = vmatprep.subr.bf16.mxu0 %v3445_v1  ;;  %v3509_v62 = vld [vmem:[#allocation8 + $0x448] ss:$16 sps:$4 sm:$0xff]   ;;  %v3607_v63 = vld [vmem:[#allocation10 + $0x24] ss:$8 sps:$4 sm:$0xff]  }
 0x19a   :  { %v3605_v1 = vld [vmem:[#allocation10 + $0x20] ss:$8 sps:$4 sm:$0xff]  }
 0x19c   :  { %2191 = vmatpush1.bf16.msra.mxu1 %v3446_v2  ;;  %2109 = vmatpush1.bf16.msra.mxu0 %v3443_v3  ;;  %v3512_v2 = vld [vmem:[#allocation8 + $0x468] ss:$16 sps:$4 sm:$0xff]   ;;  %v3610_v3 = vld [vmem:[#allocation10 + $0x34] ss:$8 sps:$4 sm:$0xff]  }
 0x19d   :  { %2192 = vmatprep.subr.bf16.mxu1 %v3454_v6  ;;  %2110 = vmatprep.subr.bf16.mxu0 %v3451_v7  ;;  %v3517_v6 = vld [vmem:[#allocation8 + $0x48c] ss:$16 sps:$4 sm:$0xff]   ;;  %v3515_v7 = vld [vmem:[#allocation8 + $0x488] ss:$16 sps:$4 sm:$0xff]  }
 0x1a0   :  { %2193 = vmatpush1.bf16.msra.mxu1 %v3452_v8  ;;  %2111 = vmatpush1.bf16.msra.mxu0 %v3449_v10  ;;  %v3613_v8 = vld [vmem:[#allocation10 + $0x44] ss:$8 sps:$4 sm:$0xff]  }
 0x1a1   :  { %2194 = vmatprep.subr.bf16.mxu1 %v3460_v11  ;;  %2112 = vmatprep.subr.bf16.mxu0 %v3457_v12  ;;  %v3520_v10 = vld [vmem:[#allocation8 + $0x4ac] ss:$16 sps:$4 sm:$0xff]   ;;  %v3611_v11 = vld [vmem:[#allocation10 + $0x40] ss:$8 sps:$4 sm:$0xff]  }
 0x1a2   :  { %v3518_v12 = vld [vmem:[#allocation8 + $0x4a8] ss:$16 sps:$4 sm:$0xff]  }
 0x1a4   :  { %2195 = vmatpush1.bf16.msra.mxu1 %v3458_v14  ;;  %2113 = vmatpush1.bf16.msra.mxu0 %v3455_v15  ;;  %v3616_v14 = vld [vmem:[#allocation10 + $0x54] ss:$8 sps:$4 sm:$0xff]  }
 0x1a5   :  { %2196 = vmatprep.subr.bf16.mxu1 %v3466_v16  ;;  %2114 = vmatprep.subr.bf16.mxu0 %v3463_v18  ;;  %v3523_v15 = vld [vmem:[#allocation8 + $0x4cc] ss:$16 sps:$4 sm:$0xff]   ;;  %v3614_v16 = vld [vmem:[#allocation10 + $0x50] ss:$8 sps:$4 sm:$0xff]  }
 0x1a6   :  { %v3521_v18 = vld [vmem:[#allocation8 + $0x4c8] ss:$16 sps:$4 sm:$0xff]  }
 0x1a8   :  { %2197 = vmatpush1.bf16.msra.mxu1 %v3464_v19  ;;  %2115 = vmatpush1.bf16.msra.mxu0 %v3461_v20  ;;  %v3619_v19 = vld [vmem:[#allocation10 + $0x64] ss:$8 sps:$4 sm:$0xff]  }
 0x1a9   :  { %2198 = vmatprep.subr.bf16.mxu1 %v3472_v21  ;;  %2116 = vmatprep.subr.bf16.mxu0 %v3469_v22  ;;  %v3526_v20 = vld [vmem:[#allocation8 + $0x4ec] ss:$16 sps:$4 sm:$0xff]   ;;  %v3617_v21 = vld [vmem:[#allocation10 + $0x60] ss:$8 sps:$4 sm:$0xff]  }
 0x1aa   :  { %v3524_v22 = vld [vmem:[#allocation8 + $0x4e8] ss:$16 sps:$4 sm:$0xff]  }
 0x1ac   :  { %2199 = vmatpush1.bf16.msra.mxu1 %v3470_v23  ;;  %2117 = vmatpush1.bf16.msra.mxu0 %v3467_v25  ;;  %v3622_v23 = vld [vmem:[#allocation10 + $0x74] ss:$8 sps:$4 sm:$0xff]  }
 0x1ad   :  { %2200 = vmatprep.subr.bf16.mxu1 %v3478_v26  ;;  %2118 = vmatprep.subr.bf16.mxu0 %v3475_v27  ;;  %v3529_v25 = vld [vmem:[#allocation8 + $0x50c] ss:$16 sps:$4 sm:$0xff]   ;;  %v3620_v26 = vld [vmem:[#allocation10 + $0x70] ss:$8 sps:$4 sm:$0xff]  }
 0x1ae   :  { %v3527_v27 = vld [vmem:[#allocation8 + $0x508] ss:$16 sps:$4 sm:$0xff]  }
 0x1b0   :  { %2201 = vmatpush1.bf16.msra.mxu1 %v3476_v28  ;;  %2119 = vmatpush1.bf16.msra.mxu0 %v3473_v29  ;;  %v3532_v28 = vld [vmem:[#allocation8 + $0x52c] ss:$16 sps:$4 sm:$0xff]   ;;  %v3530_v29 = vld [vmem:[#allocation8 + $0x528] ss:$16 sps:$4 sm:$0xff]  }
 0x1b1   :  { %2202 = vmatprep.subr.bf16.mxu1 %v3484_v30  ;;  %2120 = vmatprep.subr.bf16.mxu0 %v3481_v31  ;;  %v3535_v30 = vld [vmem:[#allocation8 + $0x54c] ss:$16 sps:$4 sm:$0xff]   ;;  %v3533_v31 = vld [vmem:[#allocation8 + $0x548] ss:$16 sps:$4 sm:$0xff]  }
 0x1b4   :  { %2203 = vmatpush1.bf16.msra.mxu1 %v3482_v32  ;;  %2121 = vmatpush1.bf16.msra.mxu0 %v3479_v34  ;;  %v3538_v32 = vld [vmem:[#allocation8 + $0x56c] ss:$16 sps:$4 sm:$0xff]  }
 0x1b5   :  { %2204 = vmatprep.subr.bf16.mxu1 %v3490_v35  ;;  %2122 = vmatprep.subr.bf16.mxu0 %v3487_v36  ;;  %v3541_v34 = vld [vmem:[#allocation8 + $0x58c] ss:$16 sps:$4 sm:$0xff]   ;;  %v3539_v35 = vld [vmem:[#allocation8 + $0x588] ss:$16 sps:$4 sm:$0xff]  }
 0x1b6   :  { %v3544_v36 = vld [vmem:[#allocation8 + $0x5ac] ss:$16 sps:$4 sm:$0xff]  }
 0x1b8   :  { %2205 = vmatpush1.bf16.msra.mxu1 %v3488_v43  ;;  %2123 = vmatpush1.bf16.msra.mxu0 %v3485_v45  ;;  %v3542_v43 = vld [vmem:[#allocation8 + $0x5a8] ss:$16 sps:$4 sm:$0xff]  }
 0x1b9   :  { %2206 = vmatprep.subr.bf16.mxu1 %v3496_v17  ;;  %2124 = vmatprep.subr.bf16.mxu0 %v3493_v47  ;;  %v3545_v45 = vld [vmem:[#allocation8 + $0x5c8] ss:$16 sps:$4 sm:$0xff]   ;;  %v3550_v17 = vld [vmem:[#allocation8 + $0x5ec] ss:$16 sps:$4 sm:$0xff]  }
 0x1ba   :  { %v3548_v47 = vld [vmem:[#allocation8 + $0x5e8] ss:$16 sps:$4 sm:$0xff]  }
 0x1bc   :  { %2207 = vmatpush1.bf16.msra.mxu1 %v3494_v49  ;;  %2125 = vmatpush1.bf16.msra.mxu0 %v3491_v50  ;;  %v3551_v49 = vld [vmem:[#allocation8 + $0x608] ss:$16 sps:$4 sm:$0xff]   ;;  %v3556_v50 = vld [vmem:[#allocation8 + $0x62c] ss:$16 sps:$4 sm:$0xff]  }
 0x1bd   :  { %2208 = vmatprep.subr.bf16.mxu1 %v3502_v51  ;;  %2126 = vmatprep.subr.bf16.mxu0 %v3499_v4  ;;  %v3554_v51 = vld [vmem:[#allocation8 + $0x628] ss:$16 sps:$4 sm:$0xff]   ;;  %v3559_v4 = vld [vmem:[#allocation8 + $0x64c] ss:$16 sps:$4 sm:$0xff]  }
 0x1c0   :  { %2209 = vmatpush1.bf16.msra.mxu1 %v3500_v53  ;;  %2127 = vmatpush1.bf16.msra.mxu0 %v3497_v39  ;;  %v3562_v53 = vld [vmem:[#allocation8 + $0x66c] ss:$16 sps:$4 sm:$0xff]   ;;  %v3560_v39 = vld [vmem:[#allocation8 + $0x668] ss:$16 sps:$4 sm:$0xff]  }
 0x1c1   :  { %2219 = vmatprep.subr.bf16.mxu1 %v3505_v54  ;;  %2725 = vmatprep.subr.bf16.mxu0 %v3601_v57  ;;  %v3565_v54 = vld [vmem:[#allocation8 + $0x68c] ss:$16 sps:$4 sm:$0xff]  }
 0x1c2   :  { %v3625_v57 = vld [vmem:[#allocation10 + $0x84] ss:$8 sps:$4 sm:$0xff]  }
 0x1c3   :  { %2211 = vmatmul.mubr.bf16.vlgmr.msra.gmra.mrb[12].mxu1 %v3991_v0  ;;  %2129 = vmatmul.mubr.bf16.vlgmr.msra.gmra.mrb[8].mxu0 %v4027_v55  ;;  %v3514_v0 = vld [vmem:[#allocation8 + $0x46c] ss:$16 sps:$4 sm:$0xff]  }
 0x1c4   :  { %2220 = vmatpush1.bf16.msra.mxu1 %v3503_v5  ;;  %2251 = vmatprep.mubr.bf16.mxu1 %v4007_v24  ;;  %v3608_v24 = vld [vmem:[#allocation10 + $0x30] ss:$8 sps:$4 sm:$0xff]  }
 0x1c5   :  { %2221 = vmatprep.subr.bf16.mxu1 %v3508_v13  ;;  %2726 = vmatpush1.bf16.msra.mxu0 %v3599_v56  ;;  %v3563_v5 = vld [vmem:[#allocation8 + $0x688] ss:$16 sps:$4 sm:$0xff]   ;;  %v3568_v13 = vld [vmem:[#allocation8 + $0x6ac] ss:$16 sps:$4 sm:$0xff]  }
 0x1c6   :  { %2727 = vmatprep.subr.bf16.mxu0 %v3604_v59  ;;  %v3571_v56 = vld [vmem:[#allocation8 + $0x6cc] ss:$16 sps:$4 sm:$0xff]   ;;  %v3623_v59 = vld [vmem:[#allocation10 + $0x80] ss:$8 sps:$4 sm:$0xff]  }
 0x1c8   :  { %2222 = vmatpush1.bf16.msra.mxu1 %v3506_v58 }
 0x1c9   :  { %2223 = vmatprep.subr.bf16.mxu1 %v3511_v60  ;;  %2728 = vmatpush1.bf16.msra.mxu0 %v3602_v61  ;;  %v3569_v61 = vld [vmem:[#allocation8 + $0x6c8] ss:$16 sps:$4 sm:$0xff]  }
 0x1ca   :  { %2729 = vmatprep.subr.bf16.mxu0 %v3607_v63  ;;  %v3574_v63 = vld [vmem:[#allocation8 + $0x6ec] ss:$16 sps:$4 sm:$0xff]  }
 0x1cc   :  { %2224 = vmatpush1.bf16.msra.mxu1 %v3509_v62 }
 0x1cd   :  { %2225 = vmatprep.subr.bf16.mxu1 %v3514_v0  ;;  %2730 = vmatpush1.bf16.msra.mxu0 %v3605_v1  ;;  %v3628_v0 = vld [vmem:[#allocation10 + $0x94] ss:$8 sps:$4 sm:$0xff]   ;;  %v3626_v1 = vld [vmem:[#allocation10 + $0x90] ss:$8 sps:$4 sm:$0xff]  }
 0x1ce   :  { %2731 = vmatprep.subr.bf16.mxu0 %v3610_v3  ;;  %v3577_v3 = vld [vmem:[#allocation8 + $0x70c] ss:$16 sps:$4 sm:$0xff]  }
 0x1d0   :  { %2226 = vmatpush1.bf16.msra.mxu1 %v3512_v2  ;;  %v3572_v2 = vld [vmem:[#allocation8 + $0x6e8] ss:$16 sps:$4 sm:$0xff]  }
 0x1d1   :  { %2227 = vmatprep.subr.bf16.mxu1 %v3517_v6  ;;  %2732 = vmatpush1.bf16.msra.mxu0 %v3608_v24  ;;  %v3631_v6 = vld [vmem:[#allocation10 + $0xa4] ss:$8 sps:$4 sm:$0xff]   ;;  %v3629_v24 = vld [vmem:[#allocation10 + $0xa0] ss:$8 sps:$4 sm:$0xff]  }
 0x1d2   :  { %2733 = vmatprep.subr.bf16.mxu0 %v3613_v8  ;;  %v3580_v8 = vld [vmem:[#allocation8 + $0x72c] ss:$16 sps:$4 sm:$0xff]  }
 0x1d4   :  { %2228 = vmatpush1.bf16.msra.mxu1 %v3515_v7  ;;  %v3575_v7 = vld [vmem:[#allocation8 + $0x708] ss:$16 sps:$4 sm:$0xff]  }
 0x1d5   :  { %2229 = vmatprep.subr.bf16.mxu1 %v3520_v10  ;;  %2734 = vmatpush1.bf16.msra.mxu0 %v3611_v11  ;;  %v3634_v10 = vld [vmem:[#allocation10 + $0xb4] ss:$8 sps:$4 sm:$0xff]   ;;  %v3632_v11 = vld [vmem:[#allocation10 + $0xb0] ss:$8 sps:$4 sm:$0xff]  }
 0x1d6   :  { %2735 = vmatprep.subr.bf16.mxu0 %v3616_v14  ;;  %v3583_v14 = vld [vmem:[#allocation8 + $0x74c] ss:$16 sps:$4 sm:$0xff]  }
 0x1d8   :  { %2230 = vmatpush1.bf16.msra.mxu1 %v3518_v12  ;;  %v3578_v12 = vld [vmem:[#allocation8 + $0x728] ss:$16 sps:$4 sm:$0xff]  }
 0x1d9   :  { %2231 = vmatprep.subr.bf16.mxu1 %v3523_v15  ;;  %2736 = vmatpush1.bf16.msra.mxu0 %v3614_v16  ;;  %v3637_v15 = vld [vmem:[#allocation10 + $0xc4] ss:$8 sps:$4 sm:$0xff]   ;;  %v3635_v16 = vld [vmem:[#allocation10 + $0xc0] ss:$8 sps:$4 sm:$0xff]  }
 0x1da   :  { %2737 = vmatprep.subr.bf16.mxu0 %v3619_v19  ;;  %v3586_v19 = vld [vmem:[#allocation8 + $0x76c] ss:$16 sps:$4 sm:$0xff]  }
 0x1dc   :  { %2232 = vmatpush1.bf16.msra.mxu1 %v3521_v18  ;;  %v3581_v18 = vld [vmem:[#allocation8 + $0x748] ss:$16 sps:$4 sm:$0xff]  }
 0x1dd   :  { %2233 = vmatprep.subr.bf16.mxu1 %v3526_v20  ;;  %2738 = vmatpush1.bf16.msra.mxu0 %v3617_v21  ;;  %v3638_v20 = vld [vmem:[#allocation10 + $0xd0] ss:$8 sps:$4 sm:$0xff]   ;;  %v3640_v21 = vld [vmem:[#allocation10 + $0xd4] ss:$8 sps:$4 sm:$0xff]  }
 0x1de   :  { %2739 = vmatprep.subr.bf16.mxu0 %v3622_v23  ;;  %v3584_v23 = vld [vmem:[#allocation8 + $0x768] ss:$16 sps:$4 sm:$0xff]  }
 0x1e0   :  { %2234 = vmatpush1.bf16.msra.mxu1 %v3524_v22  ;;  %v3643_v22 = vld [vmem:[#allocation10 + $0xe4] ss:$8 sps:$4 sm:$0xff]  }
 0x1e1   :  { %2235 = vmatprep.subr.bf16.mxu1 %v3529_v25  ;;  %2740 = vmatpush1.bf16.msra.mxu0 %v3620_v26  ;;  %v3589_v25 = vld [vmem:[#allocation8 + $0x78c] ss:$16 sps:$4 sm:$0xff]   ;;  %v3641_v26 = vld [vmem:[#allocation10 + $0xe0] ss:$8 sps:$4 sm:$0xff]  }
 0x1e2   :  { %2741 = vmatprep.subr.bf16.mxu0 %v3625_v57  ;;  %v3647_v57 = vld [vmem:[#allocation10 + $0x100] ss:$8 sps:$4 sm:$0xff]  }
 0x1e4   :  { %2236 = vmatpush1.bf16.msra.mxu1 %v3527_v27  ;;  %v3646_v27 = vld [vmem:[#allocation10 + $0xf4] ss:$8 sps:$4 sm:$0xff]  }
 0x1e5   :  { %2237 = vmatprep.subr.bf16.mxu1 %v3532_v28  ;;  %2742 = vmatpush1.bf16.msra.mxu0 %v3623_v59  ;;  %v3587_v28 = vld [vmem:[#allocation8 + $0x788] ss:$16 sps:$4 sm:$0xff]   ;;  %v3652_v59 = vld [vmem:[#allocation10 + $0x114] ss:$8 sps:$4 sm:$0xff]  }
 0x1e6   :  { %2743 = vmatprep.subr.bf16.mxu0 %v3628_v0  ;;  %v3656_v0 = vld [vmem:[#allocation10 + $0x130] ss:$8 sps:$4 sm:$0xff]  }
 0x1e8   :  { %2238 = vmatpush1.bf16.msra.mxu1 %v3530_v29  ;;  %v3592_v29 = vld [vmem:[#allocation8 + $0x7ac] ss:$16 sps:$4 sm:$0xff]  }
 0x1e9   :  { %2239 = vmatprep.subr.bf16.mxu1 %v3535_v30  ;;  %2744 = vmatpush1.bf16.msra.mxu0 %v3626_v1  ;;  %v3644_v30 = vld [vmem:[#allocation10 + $0xf0] ss:$8 sps:$4 sm:$0xff]   ;;  %v3661_v1 = vld [vmem:[#allocation10 + $0x144] ss:$8 sps:$4 sm:$0xff]  }
 0x1ea   :  { %2745 = vmatprep.subr.bf16.mxu0 %v3631_v6  ;;  %v3662_v6 = vld [vmem:[#allocation10 + $0x150] ss:$8 sps:$4 sm:$0xff]  }
 0x1ec   :  { %2240 = vmatpush1.bf16.msra.mxu1 %v3533_v31  ;;  %v3590_v31 = vld [vmem:[#allocation8 + $0x7a8] ss:$16 sps:$4 sm:$0xff]  }
 0x1ed   :  { %2241 = vmatprep.subr.bf16.mxu1 %v3538_v32  ;;  %2746 = vmatpush1.bf16.msra.mxu0 %v3629_v24  ;;  %v3595_v32 = vld [vmem:[#allocation8 + $0x7cc] ss:$16 sps:$4 sm:$0xff]  }
 0x1ee   :  { %2747 = vmatprep.subr.bf16.mxu0 %v3634_v10  ;;  %v3667_v24 = vld [vmem:[#allocation10 + $0x164] ss:$8 sps:$4 sm:$0xff]   ;;  %v3668_v10 = vld [vmem:[#allocation10 + $0x170] ss:$8 sps:$4 sm:$0xff]  }
 0x1f0   :  { %2242 = vmatpush1.bf16.msra.mxu1 %v3536_v33  ;;  %v3593_v33 = vld [vmem:[#allocation8 + $0x7c8] ss:$16 sps:$4 sm:$0xff]  }
 0x1f1   :  { %2243 = vmatprep.subr.bf16.mxu1 %v3541_v34  ;;  %2748 = vmatpush1.bf16.msra.mxu0 %v3632_v11  ;;  %v3649_v34 = vld [vmem:[#allocation10 + $0x104] ss:$8 sps:$4 sm:$0xff]  }
 0x1f2   :  { %2749 = vmatprep.subr.bf16.mxu0 %v3637_v15  ;;  %v3673_v11 = vld [vmem:[#allocation10 + $0x184] ss:$8 sps:$4 sm:$0xff]   ;;  %v3674_v15 = vld [vmem:[#allocation10 + $0x190] ss:$8 sps:$4 sm:$0xff]  }
 0x1f4   :  { %2244 = vmatpush1.bf16.msra.mxu1 %v3539_v35  ;;  %v3598_v35 = vld [vmem:[#allocation8 + $0x7ec] ss:$16 sps:$4 sm:$0xff]  }
 0x1f5   :  { %2245 = vmatprep.subr.bf16.mxu1 %v3544_v36  ;;  %2750 = vmatpush1.bf16.msra.mxu0 %v3635_v16  ;;  %v3596_v36 = vld [vmem:[#allocation8 + $0x7e8] ss:$16 sps:$4 sm:$0xff]   ;;  %v3679_v16 = vld [vmem:[#allocation10 + $0x1a4] ss:$8 sps:$4 sm:$0xff]  }
 0x1f6   :  { %2751 = vmatprep.subr.bf16.mxu0 %v3640_v21  ;;  %v3685_v21 = vld [vmem:[#allocation10 + $0x1c4] ss:$8 sps:$4 sm:$0xff]  }
 0x1f8   :  { %2246 = vmatpush1.bf16.msra.mxu1 %v3542_v43  ;;  %v4042_v43 = vld [vmem:[%s4077_s4] sm:$0xf] }
 0x1f9   :  { %2247 = vmatprep.subr.bf16.mxu1 %v3547_v44  ;;  %2752 = vmatpush1.bf16.msra.mxu0 %v3638_v20  ;;  %v676_v44 = vrot.slane %v4042_v43, %v3971_v38  ;;  %v3680_v20 = vld [vmem:[#allocation10 + $0x1b0] ss:$8 sps:$4 sm:$0xff]  }
 0x1fa   :  { %2753 = vmatprep.subr.bf16.mxu0 %v3643_v22  ;;  %v3683_v22 = vld [vmem:[#allocation10 + $0x1c0] ss:$8 sps:$4 sm:$0xff]  }
 0x1fc   :  { %2248 = vmatpush1.bf16.msra.mxu1 %v3545_v45  ;;  %v680_v45 = vrot.slane %v4042_v43, %v3977_v41 }
 0x1fd   :  { %2249 = vmatprep.subr.bf16.mxu1 %v3550_v17  ;;  %2754 = vmatpush1.bf16.msra.mxu0 %v3641_v26  ;;  %v3691_v26 = vld [vmem:[#allocation10 + $0x1e4] ss:$8 sps:$4 sm:$0xff]  }
 0x1fe   :  { %2755 = vmatprep.subr.bf16.mxu0 %v3646_v27  ;;  %v3689_v27 = vld [vmem:[#allocation10 + $0x1e0] ss:$8 sps:$4 sm:$0xff]  }
 0x200   :  { %2250 = vmatpush1.bf16.msra.mxu1 %v3548_v47 }
 0x201   :  { %2260 = vmatprep.subr.bf16.mxu1 %v3553_v48  ;;  %2756 = vmatpush1.bf16.msra.mxu0 %v3644_v30  ;;  %v684_v30 = vrot.slane %v4042_v43, %v121_v40 }
 0x202   :  { %2766 = vmatprep.subr.bf16.mxu0 %v3649_v34 }
 0x203   :  { %2252 = vmatmul.mubr.bf16.vlgmr.msra.gmra.mrb[12].mxu1 %v4016_v9  ;;  %v3566_v9 = vld [vmem:[#allocation8 + $0x6a8] ss:$16 sps:$4 sm:$0xff]  }
 0x204   :  { %2261 = vmatpush1.bf16.msra.mxu1 %v3551_v49  ;;  %2292 = vmatprep.mubr.bf16.mxu1 %v4019_v46 }
 0x205   :  { %2262 = vmatprep.subr.bf16.mxu1 %v3556_v50 }
 0x208   :  { %2263 = vmatpush1.bf16.msra.mxu1 %v3554_v51 }
 0x209   :  { %2264 = vmatprep.subr.bf16.mxu1 %v3559_v4 }
 0x20c   :  { %2265 = vmatpush1.bf16.msra.mxu1 %v3557_v52 }
 0x20d   :  { %2266 = vmatprep.subr.bf16.mxu1 %v3562_v53 }
 0x210   :  { %2267 = vmatpush1.bf16.msra.mxu1 %v3560_v39 }
 0x211   :  { %2268 = vmatprep.subr.bf16.mxu1 %v3565_v54 }
 0x214   :  { %2269 = vmatpush1.bf16.msra.mxu1 %v3563_v5 }
 0x215   :  { %2270 = vmatprep.subr.bf16.mxu1 %v3568_v13 }
 0x216   :  { %v4034_v46 = vpop.f32.mrb[8].mxu1 }
 0x217   :  { %v4036_v58 = vpop.f32.mrb[9].mxu1  ;;  %v2008_v17 = vadd.f32 %v4034_v46, %v676_v44 }
 0x218   :  { %2271 = vmatpush1.bf16.msra.mxu1 %v3566_v9  ;;  %v2011_v60 = vpop.f32.mrb[10].mxu1  ;;  %v2010_v47 = vadd.f32 %v4036_v58, %v680_v45 }
 0x219   :  { %v2012_v62 = vpop.f32.mrb[11].mxu1  ;;  %2272 = vmatprep.subr.bf16.mxu1 %v3571_v56  ;;  %v3650_v60 = vld [vmem:[#allocation10 + $0x110] ss:$8 sps:$4 sm:$0xff]  }
 0x21a   :  { %v3653_v62 = vld [vmem:[#allocation10 + $0x120] ss:$8 sps:$4 sm:$0xff]  }
 0x21c   :  { %2273 = vmatpush1.bf16.msra.mxu1 %v3569_v61  ;;  %v3655_v61 = vld [vmem:[#allocation10 + $0x124] ss:$8 sps:$4 sm:$0xff]  }
 0x21d   :  { %2274 = vmatprep.subr.bf16.mxu1 %v3574_v63  ;;  %v3658_v63 = vld [vmem:[#allocation10 + $0x134] ss:$8 sps:$4 sm:$0xff]  }
 0x220   :  { %2275 = vmatpush1.bf16.msra.mxu1 %v3572_v2  ;;  %v3659_v2 = vld [vmem:[#allocation10 + $0x140] ss:$8 sps:$4 sm:$0xff]  }
 0x221   :  { %2276 = vmatprep.subr.bf16.mxu1 %v3577_v3  ;;  %v3664_v3 = vld [vmem:[#allocation10 + $0x154] ss:$8 sps:$4 sm:$0xff]  }
 0x224   :  { %2277 = vmatpush1.bf16.msra.mxu1 %v3575_v7  ;;  %v3665_v7 = vld [vmem:[#allocation10 + $0x160] ss:$8 sps:$4 sm:$0xff]  }
 0x225   :  { %2278 = vmatprep.subr.bf16.mxu1 %v3580_v8  ;;  %v3670_v8 = vld [vmem:[#allocation10 + $0x174] ss:$8 sps:$4 sm:$0xff]  }
 0x228   :  { %2279 = vmatpush1.bf16.msra.mxu1 %v3578_v12  ;;  %v3671_v12 = vld [vmem:[#allocation10 + $0x180] ss:$8 sps:$4 sm:$0xff]  }
 0x229   :  { %2280 = vmatprep.subr.bf16.mxu1 %v3583_v14  ;;  %v3676_v14 = vld [vmem:[#allocation10 + $0x194] ss:$8 sps:$4 sm:$0xff]  }
 0x22c   :  { %2281 = vmatpush1.bf16.msra.mxu1 %v3581_v18  ;;  %v3677_v18 = vld [vmem:[#allocation10 + $0x1a0] ss:$8 sps:$4 sm:$0xff]  }
 0x22d   :  { %2282 = vmatprep.subr.bf16.mxu1 %v3586_v19  ;;  %v3682_v19 = vld [vmem:[#allocation10 + $0x1b4] ss:$8 sps:$4 sm:$0xff]  }
 0x230   :  { %2283 = vmatpush1.bf16.msra.mxu1 %v3584_v23  ;;  %v3688_v23 = vld [vmem:[#allocation10 + $0x1d4] ss:$8 sps:$4 sm:$0xff]  }
 0x231   :  { %2284 = vmatprep.subr.bf16.mxu1 %v3589_v25  ;;  %v3686_v25 = vld [vmem:[#allocation10 + $0x1d0] ss:$8 sps:$4 sm:$0xff]  }
 0x234   :  { %2285 = vmatpush1.bf16.msra.mxu1 %v3587_v28  ;;  %v3694_v28 = vld [vmem:[#allocation10 + $0x1f4] ss:$8 sps:$4 sm:$0xff]  }
 0x235   :  { %2286 = vmatprep.subr.bf16.mxu1 %v3592_v29  ;;  %v3692_v29 = vld [vmem:[#allocation10 + $0x1f0] ss:$8 sps:$4 sm:$0xff]  }
 0x238   :  { %2287 = vmatpush1.bf16.msra.mxu1 %v3590_v31  ;;  %v688_v31 = vrot.slane %v4042_v43, %v125_v42  ;;  %v2393_v43 = vld [vmem:[%s4079_s6] sm:$0x3] }
 0x239   :  { %2288 = vmatprep.subr.bf16.mxu1 %v3595_v32 }
 0x23c   :  { %2289 = vmatpush1.bf16.msra.mxu1 %v3593_v33 }
 0x23d   :  { %2290 = vmatprep.subr.bf16.mxu1 %v3598_v35 }
 0x240   :  { %2291 = vmatpush1.bf16.msra.mxu1 %v3596_v36 }
 0x243   :  { %2293 = vmatmul.mubr.bf16.vlgmr.msra.gmra.mrb[12].mxu1 %v4027_v55 }
 0x296   :  { %v2130_v48 = vpop.f32.mrb[8].mxu0 }
 0x297   :  { %v3171_v49 = vadd.f32 %v2130_v48, %v2008_v17  ;;  %v2132_v50 = vpop.f32.mrb[9].mxu0 }
 0x298   :  { %v3173_v51 = vadd.f32 %v2132_v50, %v2010_v47  ;;  %v2134_v55 = vpop.f32.mrb[10].mxu0 }
 0x299   :  { %v3102_v4 = vmul.f32 -1.442695, %v3171_v49  ;;  %v2135_v52 = vpop.f32.mrb[11].mxu0  ;;  %v2398_v55 = vrot.slane %v2393_v43, %v3971_v38 }
 0x29a   :  { %v3103_v53 = vmul.f32 -1.442695, %v3173_v51 }
 0x29b   :  { %3695 = vpow2.f32 %v3102_v4  ;;  %v2402_v4 = vrot.slane %v2393_v43, %v3977_v41 }
 0x29c   :  { %3697 = vpow2.f32 %v3103_v53 }
 0x2a5   :  { %v3696_v39 = vpop.eup %3695 }
 0x2a6   :  { %v3698_v54 = vpop.eup %3697  ;;  %v2313_v5 = vadd.f32 1.0, %v3696_v39 }
 0x2a7   :  { %v2314_v13 = vadd.f32 1.0, %v3698_v54 }
 0x2a8   :  { %3699 = vrcp.f32 %v2313_v5 }
 0x2a9   :  { %3701 = vrcp.f32 %v2314_v13 }
 0x2b2   :  { %v3700_v9 = vpop.eup %3699 }
 0x2b3   :  { %v3702_v56 = vpop.eup %3701  ;;  %v2325_v58 = vpack.c.bf16 %v3700_v9, %v3700_v9 }
 0x2b4   :  { %v2326_v46 = vpack.c.bf16 %v3702_v56, %v3702_v56 }
 0x2b6   :  { %2757 = vmatprep.mubr.bf16.mxu0 %v2326_v46 }
 0x2b7   :  { %2758 = vmatmul.mubr.bf16.vlgmr.msra.gmra.mrb[12].mxu0 %v2325_v58 }
 0x2b8   :  { %2767 = vmatpush1.bf16.msra.mxu0 %v3647_v57 }
 0x2b9   :  { %2768 = vmatprep.subr.bf16.mxu0 %v3652_v59 }
 0x2bc   :  { %2769 = vmatpush1.bf16.msra.mxu0 %v3650_v60 }
 0x2bd   :  { %2770 = vmatprep.subr.bf16.mxu0 %v3655_v61 }
 0x2c0   :  { %2771 = vmatpush1.bf16.msra.mxu0 %v3653_v62 }
 0x2c1   :  { %2772 = vmatprep.subr.bf16.mxu0 %v3658_v63 }
 0x2c4   :  { %2773 = vmatpush1.bf16.msra.mxu0 %v3656_v0 }
 0x2c5   :  { %2774 = vmatprep.subr.bf16.mxu0 %v3661_v1 }
 0x2c8   :  { %2775 = vmatpush1.bf16.msra.mxu0 %v3659_v2 }
 0x2c9   :  { %2776 = vmatprep.subr.bf16.mxu0 %v3664_v3 }
 0x2cc   :  { %2777 = vmatpush1.bf16.msra.mxu0 %v3662_v6 }
 0x2cd   :  { %2778 = vmatprep.subr.bf16.mxu0 %v3667_v24 }
 0x2d0   :  { %2779 = vmatpush1.bf16.msra.mxu0 %v3665_v7 }
 0x2d1   :  { %2780 = vmatprep.subr.bf16.mxu0 %v3670_v8 }
 0x2d4   :  { %2781 = vmatpush1.bf16.msra.mxu0 %v3668_v10 }
 0x2d5   :  { %2782 = vmatprep.subr.bf16.mxu0 %v3673_v11 }
 0x2d8   :  { %2783 = vmatpush1.bf16.msra.mxu0 %v3671_v12 }
 0x2d9   :  { %2784 = vmatprep.subr.bf16.mxu0 %v3676_v14 }
 0x2dc   :  { %2785 = vmatpush1.bf16.msra.mxu0 %v3674_v15 }
 0x2dd   :  { %2786 = vmatprep.subr.bf16.mxu0 %v3679_v16 }
 0x2e0   :  { %2787 = vmatpush1.bf16.msra.mxu0 %v3677_v18 }
 0x2e1   :  { %2788 = vmatprep.subr.bf16.mxu0 %v3682_v19 }
 0x2e4   :  { %2789 = vmatpush1.bf16.msra.mxu0 %v3680_v20 }
 0x2e5   :  { %2790 = vmatprep.subr.bf16.mxu0 %v3685_v21 }
 0x2e8   :  { %2791 = vmatpush1.bf16.msra.mxu0 %v3683_v22 }
 0x2e9   :  { %2792 = vmatprep.subr.bf16.mxu0 %v3688_v23 }
 0x2ec   :  { %2793 = vmatpush1.bf16.msra.mxu0 %v3686_v25 }
 0x2ed   :  { %2794 = vmatprep.subr.bf16.mxu0 %v3691_v26 }
 0x2f0   :  { %2795 = vmatpush1.bf16.msra.mxu0 %v3689_v27 }
 0x2f1   :  { %2796 = vmatprep.subr.bf16.mxu0 %v3694_v28 }
 0x2f4   :  { %2797 = vmatpush1.bf16.msra.mxu0 %v3692_v29 }
 0x316   :  { %v2294_v32 = vpop.f32.mrb[12].mxu1 }
 0x317   :  { %v3174_v33 = vadd.f32 %v2294_v32, %v684_v30  ;;  %v2296_v34 = vpop.f32.mrb[13].mxu1 }
 0x318   :  { %v3175_v35 = vadd.f32 %v2296_v34, %v688_v31  ;;  %v2298_v36 = vpop.f32.mrb[14].mxu1 }
 0x319   :  { %v3104_v44 = vmul.f32 -1.442695, %v3174_v33  ;;  %v2299_v45 = vpop.f32.mrb[15].mxu1 }
 0x31a   :  { %v3105_v17 = vmul.f32 -1.442695, %v3175_v35 }
 0x31b   :  { %3703 = vpow2.f32 %v3104_v44 }
 0x31c   :  { %3705 = vpow2.f32 %v3105_v17 }
 0x325   :  { %v3704_v47 = vpop.eup %3703 }
 0x326   :  { %v3706_v48 = vpop.eup %3705  ;;  %v2315_v49 = vadd.f32 1.0, %v3704_v47 }
 0x327   :  { %v2316_v50 = vadd.f32 1.0, %v3706_v48 }
 0x328   :  { %3707 = vrcp.f32 %v2315_v49 }
 0x329   :  { %3709 = vrcp.f32 %v2316_v50 }
 0x332   :  { %v3708_v40 = vpop.eup %3707 }
 0x333   :  { %v3710_v37 = vpop.eup %3709  ;;  %v2327_v42 = vpack.c.bf16 %v3708_v40, %v3708_v40 }
 0x334   :  { %v2328_v51 = vpack.c.bf16 %v3710_v37, %v3710_v37 }
 0x336   :  { %2798 = vmatprep.mubr.bf16.mxu0 %v2328_v51 }
 0x337   :  { %2799 = vmatmul.mubr.bf16.vlgmr.msra.gmra.mrb[12].mxu0 %v2327_v42 }
 0x40a   :  { %v2800_v52 = vpop.f32.mrb[12].mxu0 }
 0x40b   :  { %v3176_v53 = vadd.f32 %v2800_v52, %v2398_v55  ;;  %v2802_v39 = vpop.f32.mrb[13].mxu0 }
 0x40c   :  { %v3177_v54 = vadd.f32 %v2802_v39, %v2402_v4  ;;  %v2804_v5 = vpop.f32.mrb[14].mxu0 }
 0x40d   :  { %2807 = vst [vmem:[#allocation11] sm:$0xff] %v3176_v53  ;;  %v2805_v13 = vpop.f32.mrb[15].mxu0 }
 0x40e   :  { %2808 = vst [vmem:[#allocation11 + $0x8] sm:$0xff] %v3177_v54 }
 0x40f   :  { %3832 = shalt.err (!%p3829_p2)
}
 0x410   :  { %s3833_s21 = scalar_lea.hbm %s4080_s7, 256 }
 0x411   :  { %p3834_p3 = scmp.ne.s32.totalorder %s4080_s7, %s3833_s21  ;;  %p3837_p4 = scmp.lt.u32.totalorder %s3833_s21, %s4080_s7 }
 0x413   :  { %p3839_p5 = pnand %p3837_p4, %p3834_p3 }
 0x415   :  { %3842 = shalt.err (!%p3839_p5)
}
 0x416   :  { %2818 = dma.vmem_to_hbm [thread:$0]  %s2816_s18, 256, %s4080_s7, [#allocation4]  }
 0x417   :  { %3849 = dma.done.wait [#allocation4], 256  }
 0x418   :  { %3850 = vsyncadd [#allocation4], 4294967040 }
 0x419   :  { %2822 = vsyncpa [#allocation3], 1 }
 0x41a   :  { %2823 = vsyncpa [#allocation6], 1 }
 0x41b   :  { %2824 = vsyncpa [#allocation9], 1 }
 0x41c   :  { %2825 = vsyncpa [#allocation4], 1 }

</bundles_post_ra>
